<compile_context>
chip_gen: v6e
topology: v6e:2x2x1
jax: 0.10.0
libtpu: 0.0.40
codegen_flags: <defaults>
</compile_context>

<pallas_src>
import jax
import jax.numpy as jnp
from jax.experimental import pallas as pl
from jax.experimental.pallas import tpu as pltpu

EPS = 1e-5          # InstanceNorm eps (PyTorch default)
NEG_SLOPE = 0.01    # F.leaky_relu default negative_slope
DROPOUT_P = 0.35    # nn.Dropout(p=0.35)


# ----------------------------------------------------------------------------
# Fused encoder kernel: conv1 -> conv2 -> flatten -> fc1 -> fc2  (BLK_B elements / step)
# ----------------------------------------------------------------------------
def _make_encoder_kernel(E, blk_b):
    N = blk_b * E  # lane extent of the batch-concatenated activations

    def encoder_kernel(gt_ref, fe_ref, avg_ref, w1_ref, w2_ref,
                       wf1_ref, bf1_ref, mask_ref, wf2_ref, bf2_ref, o_ref):
        # gt_ref  : (N, 4N)  bf16 block-diagonal fused one-ring gather (boundary -1 -> zero col)
        # fe_ref  : (Cpad0, N) f32 input features, lane layout [b][e]
        # avg_ref : (N, N)   f32 block-diagonal per-(batch,channel) averaging matrix (1/E blocks)
        # w1_ref  : (C1, 7*Cpad0) bf16 packed conv1 weight; w2_ref : (C2, 7*C1) bf16
        # wf1_ref : (C2*E, F1) bf16; bf1_ref : (1, F1) f32; mask_ref : (blk_b, F1) dropout keep
        # wf2_ref : (F1, F2)  bf16; bf2_ref : (1, F2) f32
        # o_ref   : (blk_b, F2) f32
        gt = gt_ref[...]
        avg = avg_ref[...]

        def conv_block(x, w_ref):
            # x: (Cin, N) f32 -- channels on sublanes, batch-concatenated edges on lanes.
            # Fused one-ring gather (torch index_select incl. -1 -> zero row): ONE bf16 matmul.
            g = jnp.dot(x.astype(jnp.bfloat16), gt, preferred_element_type=jnp.float32)
            f1 = g[:, 0 * N:1 * N]
            f2 = g[:, 1 * N:2 * N]
            f3 = g[:, 2 * N:3 * N]
            f4 = g[:, 3 * N:4 * N]
            # order-invariant symmetric features (f32 VPU arithmetic)
            s1 = f1 + f3
            s2 = f2 + f4
            s3 = jnp.abs(f1 - f3)
            s4 = jnp.abs(f2 - f4)
            s5 = f1 + f2 + f3 + f4
            a = 0.25 * s5
            d1 = f1 - a
            d2 = f2 - a
            d3 = f3 - a
            d4 = f4 - a
            s6 = d1 * d1 + d2 * d2 + d3 * d3 + d4 * d4
            # Stack the 7 features on sublanes: Conv2d(kernel=(1,7)) == ONE (OC,7C)@(7C,N) matmul.
            feats = jnp.concatenate([x, s1, s2, s3, s4, s5, s6], axis=0)      # (7*Cin, N)
            y = jnp.dot(w_ref[...], feats.astype(jnp.bfloat16),
                        preferred_element_type=jnp.float32)                   # (OC, N)
            # InstanceNorm2d(affine=False): per-(batch, channel) stats over the E edges,
            # computed via the block-diagonal averaging matmul (conv bias cancels; omitted).
            mean = jnp.dot(y, avg, preferred_element_type=jnp.float32)
            d = y - mean
            var = jnp.dot(d * d, avg, preferred_element_type=jnp.float32)
            yn = d * jax.lax.rsqrt(var + EPS)
            return jnp.where(yn > 0, yn, NEG_SLOPE * yn)                      # leaky_relu

        a1 = conv_block(fe_ref[...], w1_ref)     # (C1, N)
        a2 = conv_block(a1, w2_ref)              # (C2, N)

        # Flatten: x[b, c*E+e] = a2[c, b*E+e]  (exactly torch's .view(B, -1) order).
        # Static lane slices + concatenation only -- no reshape, no one-hot flatten matmul.
        C2 = a2.shape[0]
        rows = []
        for b in range(blk_b):
            seg = a2[:, b * E:(b + 1) * E]                                    # (C2, E)
            rows.append(jnp.concatenate([seg[c:c + 1, :] for c in range(C2)], axis=1))
        x = jnp.concatenate(rows, axis=0)                                     # (blk_b, C2*E)

        # FC1 -> InstanceNorm1d -> leaky_relu -> dropout (train-mode scaling).
        # InstanceNorm1d is applied to fe.unsqueeze(1) i.e. (B,1,L): normalize each row over L.
        h = jnp.dot(x.astype(jnp.bfloat16), wf1_ref[...],
                    preferred_element_type=jnp.float32) + bf1_ref[...]
        mean = jnp.mean(h, axis=1, keepdims=True)
        var = jnp.mean((h - mean) ** 2, axis=1, keepdims=True)
        h = (h - mean) * jax.lax.rsqrt(var + EPS)
        h = jnp.where(h > 0, h, NEG_SLOPE * h)
        h = h * mask_ref[...] * (1.0 / (1.0 - DROPOUT_P))

        # FC2 -> InstanceNorm1d (last FC: no activation / no dropout).
        z = jnp.dot(h.astype(jnp.bfloat16), wf2_ref[...],
                    preferred_element_type=jnp.float32) + bf2_ref[...]
        mean = jnp.mean(z, axis=1, keepdims=True)
        var = jnp.mean((z - mean) ** 2, axis=1, keepdims=True)
        o_ref[...] = (z - mean) * jax.lax.rsqrt(var + EPS)

    return encoder_kernel


# ----------------------------------------------------------------------------
# Host-side packing helpers (one-time glue, no per-step HBM traffic beyond the blocks)
# ----------------------------------------------------------------------------
def pack_conv_weight(w, cpad):
    """torch Conv2d weight (OC, IC, 7) (the 1 squeezed) -> (OC, 7*cpad) bf16, zero-padded on
    the channel axis so the in-kernel feature stack is 8-sublane aligned."""
    oc, ic, k = w.shape
    wt = jnp.transpose(w, (0, 2, 1))                                  # (OC, 7, IC)
    wp = jnp.zeros((oc, k, cpad), jnp.float32).at[:, :, :ic].set(wt)
    return wp.reshape(oc, k * cpad).astype(jnp.bfloat16)


def build_gather_blocks(gemm, E, blk_b):
    """(B, E, 4) int32 one-ring indices (-1 = boundary) -> (B/blk_b, N, 4N) bf16 fused,
    block-diagonal gather matrices with
        G[g, b*E + n, j*N + b*E + e'] = [gemm[g*blk_b + b, e', j] == n],
    so x (C, N) @ G == the 4 neighbor gathers, laid out as 4 contiguous lane ranges."""
    B = gemm.shape[0]
    n_blk = B // blk_b
    gj = jnp.transpose(gemm.astype(jnp.int32).reshape(n_blk, blk_b, E, 4),
                       (0, 1, 3, 2))                                  # (G, b', j, e')
    n = jnp.arange(E, dtype=jnp.int32)
    onehot = (gj[:, :, :, None, :] == n[None, None, None, :, None])   # (G, b', j, n, e')
    eye_b = jnp.eye(blk_b, dtype=bool)                                # (b, b')
    big = onehot[:, None] & eye_b[None, :, :, None, None, None]       # (G, b, b', j, n, e')
    big = jnp.transpose(big, (0, 1, 4, 3, 2, 5))                      # (G, b, n, j, b', e')
    return big.reshape(n_blk, blk_b * E, 4 * blk_b * E).astype(jnp.bfloat16)


def build_segment_avg(E, blk_b):
    """(N, N) f32 block-diagonal averaging matrix: y @ Avg broadcasts the per-(batch,channel)
    mean over that batch element's E lanes."""
    m = jnp.arange(blk_b * E)
    return jnp.where((m[:, None] // E) == (m[None, :] // E), 1.0 / E, 0.0).astype(jnp.float32)


# ----------------------------------------------------------------------------
# MeshEncoder forward (single fused pallas_call, batch-blocked grid)
# ----------------------------------------------------------------------------
def mesh_encoder_forward(fe, gemm, params, dropout_mask, blk_b=4):
    """fe: (B, C0, E) f32 edge features (channels-first, like PyTorch);
    gemm: (B, E, 4) int32 one-ring indices (-1 = boundary);
    dropout_mask: (B, fcs[0]) f32 keep-mask for the single hidden FC.
    Returns (out (B, fcs[-1]), encoder_outs)."""
    B, C0, E = fe.shape
    assert B % blk_b == 0, "batch must be divisible by the batch block"
    n_blk = B // blk_b          # keep n_blk >= 2 so v7x megacore can split grid steps
    N = blk_b * E

    conv_ws = [w for (w, _b) in params["convs"]]
    (wf1, bf1), (wf2, bf2) = params["fcs"]
    C1, C2 = conv_ws[0].shape[0], conv_ws[1].shape[0]
    F1, F2 = wf1.shape[1], wf2.shape[1]
    assert C1 % 8 == 0 and C2 % 8 == 0, "intermediate channel counts must be multiples of 8"

    # channel-pad the input so every feature block is one full sublane tile
    cpad0 = -(-C0 // 8) * 8
    fe_f = fe.astype(jnp.float32)
    if cpad0 != C0:
        fe_f = jnp.concatenate(
            [fe_f, jnp.zeros((B, cpad0 - C0, E), jnp.float32)], axis=1)
    # batch-block + lane-concat the edges: (n_blk, Cpad0, blk_b*E), lane layout [b][e]
    fe_blk = fe_f.reshape(n_blk, blk_b, cpad0, E).transpose(0, 2, 1, 3).reshape(n_blk, cpad0, N)

    w1p = pack_conv_weight(conv_ws[0], cpad0)                         # (C1, 7*cpad0) bf16
    w2p = pack_conv_weight(conv_ws[1], C1)                            # (C2, 7*C1)    bf16
    gt = build_gather_blocks(gemm, E, blk_b)                          # (n_blk, N, 4N) bf16
    avg = build_segment_avg(E, blk_b)                                 # (N, N) f32
    wf1b = wf1.astype(jnp.bfloat16)
    wf2b = wf2.astype(jnp.bfloat16)
    bf1f = bf1.reshape(1, F1).astype(jnp.float32)
    bf2f = bf2.reshape(1, F2).astype(jnp.float32)
    mask_blk = dropout_mask.astype(jnp.float32).reshape(n_blk, blk_b, F1)

    kernel = _make_encoder_kernel(E, blk_b)

    out = pl.pallas_call(
        kernel,
        out_shape=jax.ShapeDtypeStruct((n_blk, blk_b, F2), jnp.float32),
        grid=(n_blk,),
        in_specs=[
            pl.BlockSpec((None, N, 4 * N), lambda g: (g, 0, 0)),      # fused gather block
            pl.BlockSpec((None, cpad0, N), lambda g: (g, 0, 0)),      # input features
            pl.BlockSpec((N, N), lambda g: (0, 0)),                   # segment-average matrix
            pl.BlockSpec(w1p.shape, lambda g: (0, 0)),                # conv1 weight (resident)
            pl.BlockSpec(w2p.shape, lambda g: (0, 0)),                # conv2 weight (resident)
            pl.BlockSpec(wf1b.shape, lambda g: (0, 0)),               # fc1 weight  (resident)
            pl.BlockSpec(bf1f.shape, lambda g: (0, 0)),               # fc1 bias
            pl.BlockSpec((None, blk_b, F1), lambda g: (g, 0, 0)),     # dropout keep-mask
            pl.BlockSpec(wf2b.shape, lambda g: (0, 0)),               # fc2 weight  (resident)
            pl.BlockSpec(bf2f.shape, lambda g: (0, 0)),               # fc2 bias
        ],
        out_specs=pl.BlockSpec((None, blk_b, F2), lambda g: (g, 0, 0)),
        compiler_params=pltpu.CompilerParams(
            dimension_semantics=("parallel",)),   # megacore: grid steps split across TCs
    )(gt, fe_blk, avg, w1p, w2p, wf1b, bf1f, mask_blk, wf2b, bf2f)

    out = out.reshape(B, F2)
    encoder_outs = [None] * len(params["convs"])   # pool=0 => before_pool is None
    return out, encoder_outs


# ----------------------------------------------------------------------------
# Pure-JAX reference (same math, exact gather) for the numerical sanity check
# ----------------------------------------------------------------------------
def ref_downconv(fe, gemm, w, b):
    B, C, E = fe.shape
    edge_ids = jnp.broadcast_to(
        jnp.arange(E, dtype=jnp.int32)[None, :, None], (B, E, 1))
    Gi = jnp.concatenate([edge_ids, gemm.astype(jnp.int32)], axis=-1) + 1     # (B,E,5)
    fe_pad = jnp.concatenate([jnp.zeros((B, C, 1), fe.dtype), fe], axis=2)    # (B,C,E+1)
    gathered = jax.vmap(lambda xp, gi: xp[:, gi])(fe_pad, Gi)                 # (B,C,E,5)
    f = jnp.transpose(gathered, (0, 3, 2, 1)).astype(jnp.float32)             # (B,5,E,C)
    f0, f1, f2, f3, f4 = (f[:, j] for j in range(5))
    x1 = f1 + f3
    x2 = f2 + f4
    x3 = jnp.abs(f1 - f3)
    x4 = jnp.abs(f2 - f4)
    x5 = f1 + f2 + f3 + f4
    avg = x5 / 4
    x6 = sum((fi - avg) ** 2 for fi in (f1, f2, f3, f4))
    feats = (f0, x1, x2, x3, x4, x5, x6)
    y = sum(jnp.einsum("bec,oc->beo", feats[j], w[:, :, j]) for j in range(7))
    y = y + b[None, None, :]
    mean = jnp.mean(y, axis=1, keepdims=True)
    var = jnp.mean((y - mean) ** 2, axis=1, keepdims=True)
    y = (y - mean) * jax.lax.rsqrt(var + EPS)
    y = jnp.where(y > 0, y, NEG_SLOPE * y)
    return jnp.transpose(y, (0, 2, 1))   # (B, OC, E)


def ref_forward(fe, gemm, params, dropout_mask):
    for (w, b) in params["convs"]:
        fe = ref_downconv(fe, gemm, w, b)
    B = fe.shape[0]
    x = fe.reshape(B, -1)
    n = len(params["fcs"])
    for i, (w, b) in enumerate(params["fcs"]):
        y = x @ w + b
        mean = jnp.mean(y, axis=1, keepdims=True)
        var = jnp.mean((y - mean) ** 2, axis=1, keepdims=True)
        y = (y - mean) * jax.lax.rsqrt(var + EPS)
        if i < n - 1:
            y = jnp.where(y > 0, y, NEG_SLOPE * y)
            y = y * dropout_mask * (1.0 / (1.0 - DROPOUT_P))
        x = y
    return x


# ----------------------------------------------------------------------------
# Deterministic parameter init (xavier_normal_ conv weights, zero conv bias)
# ----------------------------------------------------------------------------
def init_params(key, convs, fcs, E):
    params = {"convs": [], "fcs": []}
    keys = jax.random.split(key, (len(convs) - 1) + len(fcs))
    ki = 0
    for i in range(len(convs) - 1):
        ic, oc = convs[i], convs[i + 1]
        fan_in, fan_out = ic * 1 * 7, oc * 1 * 7
        std = (2.0 / (fan_in + fan_out)) ** 0.5        # xavier_normal_, gain=1
        w = jax.random.normal(keys[ki], (oc, ic, 7), jnp.float32) * std
        b = jnp.zeros((oc,), jnp.float32)              # nn.init.constant_(bias, 0)
        params["convs"].append((w, b))
        ki += 1
    last = convs[-1] * E                               # global_pool=None branch
    for L in fcs:
        kw, kb = jax.random.split(keys[ki])
        ki += 1
        bound = 1.0 / (last ** 0.5)                    # torch Linear default-ish
        w = jax.random.uniform(kw, (last, L), jnp.float32, -bound, bound)
        b = jax.random.uniform(kb, (1, L), jnp.float32, -bound, bound)
        params["fcs"].append((w, b))
        last = L
    return params


if __name__ == "__main__":
    B, E = 8, 16
    convs = [4, 8, 16]
    fcs = [32, 8]
    blk_b = 4          # 4 batch elements per grid step -> grid=(2,) (>=2 steps for megacore)

    key = jax.random.PRNGKey(0)
    k_fe, k_gemm, k_par, k_drop = jax.random.split(key, 4)

    fe = jax.random.normal(k_fe, (B, convs[0], E), jnp.float32)             # (B, C, E)
    gemm = jax.random.randint(k_gemm, (B, E, 4), -1, E, dtype=jnp.int32)    # mesh.gemm_edges
    params = init_params(k_par, convs, fcs, E)
    dropout_mask = jax.random.bernoulli(
        k_drop, 1.0 - DROPOUT_P, (B, fcs[0])).astype(jnp.float32)

    out, encoder_outs = mesh_encoder_forward(fe, gemm, params, dropout_mask, blk_b=blk_b)
    out = jax.block_until_ready(out)

    ref = ref_forward(fe, gemm, params, dropout_mask)
    assert out.shape == (B, fcs[-1]), out.shape
    assert encoder_outs == [None, None]
    assert jnp.allclose(out, ref, atol=5e-2, rtol=5e-2), float(jnp.max(jnp.abs(out - ref)))

    print("KERNEL_OK")
</pallas_src>

<mosaic_0001>
module attributes {stable_mosaic.version = 11 : i64} {
  func.func @encoder_kernel(%arg0: i32, %arg1: memref<1x64x256xbf16, #tpu.memory_space<vmem>>, %arg2: memref<1x8x64xf32, #tpu.memory_space<vmem>>, %arg3: memref<64x64xf32, #tpu.memory_space<vmem>>, %arg4: memref<8x56xbf16, #tpu.memory_space<vmem>>, %arg5: memref<16x56xbf16, #tpu.memory_space<vmem>>, %arg6: memref<256x32xbf16, #tpu.memory_space<vmem>>, %arg7: memref<1x32xf32, #tpu.memory_space<vmem>>, %arg8: memref<1x4x32xf32, #tpu.memory_space<vmem>>, %arg9: memref<32x8xbf16, #tpu.memory_space<vmem>>, %arg10: memref<1x8xf32, #tpu.memory_space<vmem>>, %arg11: memref<1x4x8xf32, #tpu.memory_space<vmem>>) attributes {dimension_semantics = [#tpu.dimension_semantics<parallel>], iteration_bounds = array<i64: 2>, scalar_prefetch = 0 : i64, scratch_operands = 0 : i64, tpu.core_type = #tpu.core_type<tc>, window_params = [{transform_indices = @transform_0, window_bounds = array<i64: 1, 64, 256>}, {transform_indices = @transform_1, window_bounds = array<i64: 1, 8, 64>}, {pipeline_mode = #tpu.pipeline_mode<synchronous>, transform_indices = @transform_2, window_bounds = array<i64: 64, 64>}, {pipeline_mode = #tpu.pipeline_mode<synchronous>, transform_indices = @transform_3, window_bounds = array<i64: 8, 56>}, {pipeline_mode = #tpu.pipeline_mode<synchronous>, transform_indices = @transform_4, window_bounds = array<i64: 16, 56>}, {pipeline_mode = #tpu.pipeline_mode<synchronous>, transform_indices = @transform_5, window_bounds = array<i64: 256, 32>}, {pipeline_mode = #tpu.pipeline_mode<synchronous>, transform_indices = @transform_6, window_bounds = array<i64: 1, 32>}, {transform_indices = @transform_7, window_bounds = array<i64: 1, 4, 32>}, {pipeline_mode = #tpu.pipeline_mode<synchronous>, transform_indices = @transform_8, window_bounds = array<i64: 32, 8>}, {pipeline_mode = #tpu.pipeline_mode<synchronous>, transform_indices = @transform_9, window_bounds = array<i64: 1, 8>}, {transform_indices = @transform_10, window_bounds = array<i64: 1, 4, 8>}]} {
    %c0 = arith.constant 0 : index
    %c0_0 = arith.constant 0 : index
    %c0_1 = arith.constant 0 : index
    %0 = vector.load %arg1[%c0, %c0_0, %c0_1] : memref<1x64x256xbf16, #tpu.memory_space<vmem>>, vector<1x64x256xbf16>
    %1 = vector.shape_cast %0 : vector<1x64x256xbf16> to vector<64x256xbf16>
    %c0_2 = arith.constant 0 : index
    %c0_3 = arith.constant 0 : index
    %2 = vector.load %arg3[%c0_2, %c0_3] : memref<64x64xf32, #tpu.memory_space<vmem>>, vector<64x64xf32>
    %c0_4 = arith.constant 0 : index
    %c0_5 = arith.constant 0 : index
    %c0_6 = arith.constant 0 : index
    %3 = vector.load %arg2[%c0_4, %c0_5, %c0_6] : memref<1x8x64xf32, #tpu.memory_space<vmem>>, vector<1x8x64xf32>
    %4 = vector.shape_cast %3 : vector<1x8x64xf32> to vector<8x64xf32>
    %5 = arith.truncf %4 : vector<8x64xf32> to vector<8x64xbf16>
    %cst = arith.constant dense<0.000000e+00> : vector<8x256xf32>
    %6 = tpu.matmul %5, %1, %cst {dimension_numbers = #tpu.dot_dimension_numbers<[1], [0], [0], [1], [0, 0, 1, 1], [], []>} : vector<8x64xbf16>, vector<64x256xbf16>, vector<8x256xf32> -> vector<8x256xf32>
    %7 = vector.extract_strided_slice %6 {offsets = [0, 0], sizes = [8, 64], strides = [1, 1]} : vector<8x256xf32> to vector<8x64xf32>
    %8 = vector.extract_strided_slice %6 {offsets = [0, 64], sizes = [8, 64], strides = [1, 1]} : vector<8x256xf32> to vector<8x64xf32>
    %9 = vector.extract_strided_slice %6 {offsets = [0, 128], sizes = [8, 64], strides = [1, 1]} : vector<8x256xf32> to vector<8x64xf32>
    %10 = vector.extract_strided_slice %6 {offsets = [0, 192], sizes = [8, 64], strides = [1, 1]} : vector<8x256xf32> to vector<8x64xf32>
    %11 = arith.addf %7, %9 : vector<8x64xf32>
    %12 = arith.addf %8, %10 : vector<8x64xf32>
    %13 = arith.subf %7, %9 : vector<8x64xf32>
    %14 = math.absf %13 : vector<8x64xf32>
    %15 = arith.subf %8, %10 : vector<8x64xf32>
    %16 = math.absf %15 : vector<8x64xf32>
    %17 = arith.addf %7, %8 : vector<8x64xf32>
    %18 = arith.addf %17, %9 : vector<8x64xf32>
    %19 = arith.addf %18, %10 : vector<8x64xf32>
    %cst_7 = arith.constant 2.500000e-01 : f32
    %20 = vector.broadcast %cst_7 : f32 to vector<8x64xf32>
    %21 = arith.mulf %20, %19 : vector<8x64xf32>
    %22 = arith.subf %7, %21 : vector<8x64xf32>
    %23 = arith.subf %8, %21 : vector<8x64xf32>
    %24 = arith.subf %9, %21 : vector<8x64xf32>
    %25 = arith.subf %10, %21 : vector<8x64xf32>
    %26 = arith.mulf %22, %22 : vector<8x64xf32>
    %27 = arith.mulf %23, %23 : vector<8x64xf32>
    %28 = arith.addf %26, %27 : vector<8x64xf32>
    %29 = arith.mulf %24, %24 : vector<8x64xf32>
    %30 = arith.addf %28, %29 : vector<8x64xf32>
    %31 = arith.mulf %25, %25 : vector<8x64xf32>
    %32 = arith.addf %30, %31 : vector<8x64xf32>
    %33 = tpu.concatenate %4, %11, %12, %14, %16, %19, %32 in 0 : vector<8x64xf32>, vector<8x64xf32>, vector<8x64xf32>, vector<8x64xf32>, vector<8x64xf32>, vector<8x64xf32>, vector<8x64xf32> -> vector<56x64xf32>
    %c0_8 = arith.constant 0 : index
    %c0_9 = arith.constant 0 : index
    %34 = vector.load %arg4[%c0_8, %c0_9] : memref<8x56xbf16, #tpu.memory_space<vmem>>, vector<8x56xbf16>
    %35 = arith.truncf %33 : vector<56x64xf32> to vector<56x64xbf16>
    %cst_10 = arith.constant dense<0.000000e+00> : vector<8x64xf32>
    %36 = tpu.matmul %34, %35, %cst_10 {dimension_numbers = #tpu.dot_dimension_numbers<[1], [0], [0], [1], [0, 0, 1, 1], [], []>} : vector<8x56xbf16>, vector<56x64xbf16>, vector<8x64xf32> -> vector<8x64xf32>
    %cst_11 = arith.constant dense<0.000000e+00> : vector<8x64xf32>
    %37 = tpu.matmul %36, %2, %cst_11 {dimension_numbers = #tpu.dot_dimension_numbers<[1], [0], [0], [1], [0, 0, 1, 1], [], []>} : vector<8x64xf32>, vector<64x64xf32>, vector<8x64xf32> -> vector<8x64xf32>
    %38 = arith.subf %36, %37 : vector<8x64xf32>
    %39 = arith.mulf %38, %38 : vector<8x64xf32>
    %cst_12 = arith.constant dense<0.000000e+00> : vector<8x64xf32>
    %40 = tpu.matmul %39, %2, %cst_12 {dimension_numbers = #tpu.dot_dimension_numbers<[1], [0], [0], [1], [0, 0, 1, 1], [], []>} : vector<8x64xf32>, vector<64x64xf32>, vector<8x64xf32> -> vector<8x64xf32>
    %cst_13 = arith.constant 9.99999974E-6 : f32
    %41 = vector.broadcast %cst_13 : f32 to vector<8x64xf32>
    %42 = arith.addf %40, %41 : vector<8x64xf32>
    %43 = math.rsqrt %42 : vector<8x64xf32>
    %44 = arith.mulf %38, %43 : vector<8x64xf32>
    %cst_14 = arith.constant 0.000000e+00 : f32
    %45 = vector.broadcast %cst_14 : f32 to vector<8x64xf32>
    %46 = arith.cmpf ogt, %44, %45 : vector<8x64xf32>
    %cst_15 = arith.constant 0.00999999977 : f32
    %47 = vector.broadcast %cst_15 : f32 to vector<8x64xf32>
    %48 = arith.mulf %47, %44 : vector<8x64xf32>
    %49 = arith.select %46, %44, %48 : vector<8x64xi1>, vector<8x64xf32>
    %50 = arith.truncf %49 : vector<8x64xf32> to vector<8x64xbf16>
    %cst_16 = arith.constant dense<0.000000e+00> : vector<8x256xf32>
    %51 = tpu.matmul %50, %1, %cst_16 {dimension_numbers = #tpu.dot_dimension_numbers<[1], [0], [0], [1], [0, 0, 1, 1], [], []>} : vector<8x64xbf16>, vector<64x256xbf16>, vector<8x256xf32> -> vector<8x256xf32>
    %52 = vector.extract_strided_slice %51 {offsets = [0, 0], sizes = [8, 64], strides = [1, 1]} : vector<8x256xf32> to vector<8x64xf32>
    %53 = vector.extract_strided_slice %51 {offsets = [0, 64], sizes = [8, 64], strides = [1, 1]} : vector<8x256xf32> to vector<8x64xf32>
    %54 = vector.extract_strided_slice %51 {offsets = [0, 128], sizes = [8, 64], strides = [1, 1]} : vector<8x256xf32> to vector<8x64xf32>
    %55 = vector.extract_strided_slice %51 {offsets = [0, 192], sizes = [8, 64], strides = [1, 1]} : vector<8x256xf32> to vector<8x64xf32>
    %56 = arith.addf %52, %54 : vector<8x64xf32>
    %57 = arith.addf %53, %55 : vector<8x64xf32>
    %58 = arith.subf %52, %54 : vector<8x64xf32>
    %59 = math.absf %58 : vector<8x64xf32>
    %60 = arith.subf %53, %55 : vector<8x64xf32>
    %61 = math.absf %60 : vector<8x64xf32>
    %62 = arith.addf %52, %53 : vector<8x64xf32>
    %63 = arith.addf %62, %54 : vector<8x64xf32>
    %64 = arith.addf %63, %55 : vector<8x64xf32>
    %cst_17 = arith.constant 2.500000e-01 : f32
    %65 = vector.broadcast %cst_17 : f32 to vector<8x64xf32>
    %66 = arith.mulf %65, %64 : vector<8x64xf32>
    %67 = arith.subf %52, %66 : vector<8x64xf32>
    %68 = arith.subf %53, %66 : vector<8x64xf32>
    %69 = arith.subf %54, %66 : vector<8x64xf32>
    %70 = arith.subf %55, %66 : vector<8x64xf32>
    %71 = arith.mulf %67, %67 : vector<8x64xf32>
    %72 = arith.mulf %68, %68 : vector<8x64xf32>
    %73 = arith.addf %71, %72 : vector<8x64xf32>
    %74 = arith.mulf %69, %69 : vector<8x64xf32>
    %75 = arith.addf %73, %74 : vector<8x64xf32>
    %76 = arith.mulf %70, %70 : vector<8x64xf32>
    %77 = arith.addf %75, %76 : vector<8x64xf32>
    %78 = tpu.concatenate %49, %56, %57, %59, %61, %64, %77 in 0 : vector<8x64xf32>, vector<8x64xf32>, vector<8x64xf32>, vector<8x64xf32>, vector<8x64xf32>, vector<8x64xf32>, vector<8x64xf32> -> vector<56x64xf32>
    %c0_18 = arith.constant 0 : index
    %c0_19 = arith.constant 0 : index
    %79 = vector.load %arg5[%c0_18, %c0_19] : memref<16x56xbf16, #tpu.memory_space<vmem>>, vector<16x56xbf16>
    %80 = arith.truncf %78 : vector<56x64xf32> to vector<56x64xbf16>
    %cst_20 = arith.constant dense<0.000000e+00> : vector<16x64xf32>
    %81 = tpu.matmul %79, %80, %cst_20 {dimension_numbers = #tpu.dot_dimension_numbers<[1], [0], [0], [1], [0, 0, 1, 1], [], []>} : vector<16x56xbf16>, vector<56x64xbf16>, vector<16x64xf32> -> vector<16x64xf32>
    %cst_21 = arith.constant dense<0.000000e+00> : vector<16x64xf32>
    %82 = tpu.matmul %81, %2, %cst_21 {dimension_numbers = #tpu.dot_dimension_numbers<[1], [0], [0], [1], [0, 0, 1, 1], [], []>} : vector<16x64xf32>, vector<64x64xf32>, vector<16x64xf32> -> vector<16x64xf32>
    %83 = arith.subf %81, %82 : vector<16x64xf32>
    %84 = arith.mulf %83, %83 : vector<16x64xf32>
    %cst_22 = arith.constant dense<0.000000e+00> : vector<16x64xf32>
    %85 = tpu.matmul %84, %2, %cst_22 {dimension_numbers = #tpu.dot_dimension_numbers<[1], [0], [0], [1], [0, 0, 1, 1], [], []>} : vector<16x64xf32>, vector<64x64xf32>, vector<16x64xf32> -> vector<16x64xf32>
    %cst_23 = arith.constant 9.99999974E-6 : f32
    %86 = vector.broadcast %cst_23 : f32 to vector<16x64xf32>
    %87 = arith.addf %85, %86 : vector<16x64xf32>
    %88 = math.rsqrt %87 : vector<16x64xf32>
    %89 = arith.mulf %83, %88 : vector<16x64xf32>
    %cst_24 = arith.constant 0.000000e+00 : f32
    %90 = vector.broadcast %cst_24 : f32 to vector<16x64xf32>
    %91 = arith.cmpf ogt, %89, %90 : vector<16x64xf32>
    %cst_25 = arith.constant 0.00999999977 : f32
    %92 = vector.broadcast %cst_25 : f32 to vector<16x64xf32>
    %93 = arith.mulf %92, %89 : vector<16x64xf32>
    %94 = arith.select %91, %89, %93 : vector<16x64xi1>, vector<16x64xf32>
    %95 = vector.extract_strided_slice %94 {offsets = [0, 0], sizes = [16, 16], strides = [1, 1]} : vector<16x64xf32> to vector<16x16xf32>
    %96 = vector.extract_strided_slice %95 {offsets = [0, 0], sizes = [1, 16], strides = [1, 1]} : vector<16x16xf32> to vector<1x16xf32>
    %97 = vector.extract_strided_slice %95 {offsets = [1, 0], sizes = [1, 16], strides = [1, 1]} : vector<16x16xf32> to vector<1x16xf32>
    %98 = vector.extract_strided_slice %95 {offsets = [2, 0], sizes = [1, 16], strides = [1, 1]} : vector<16x16xf32> to vector<1x16xf32>
    %99 = vector.extract_strided_slice %95 {offsets = [3, 0], sizes = [1, 16], strides = [1, 1]} : vector<16x16xf32> to vector<1x16xf32>
    %100 = vector.extract_strided_slice %95 {offsets = [4, 0], sizes = [1, 16], strides = [1, 1]} : vector<16x16xf32> to vector<1x16xf32>
    %101 = vector.extract_strided_slice %95 {offsets = [5, 0], sizes = [1, 16], strides = [1, 1]} : vector<16x16xf32> to vector<1x16xf32>
    %102 = vector.extract_strided_slice %95 {offsets = [6, 0], sizes = [1, 16], strides = [1, 1]} : vector<16x16xf32> to vector<1x16xf32>
    %103 = vector.extract_strided_slice %95 {offsets = [7, 0], sizes = [1, 16], strides = [1, 1]} : vector<16x16xf32> to vector<1x16xf32>
    %104 = vector.extract_strided_slice %95 {offsets = [8, 0], sizes = [1, 16], strides = [1, 1]} : vector<16x16xf32> to vector<1x16xf32>
    %105 = vector.extract_strided_slice %95 {offsets = [9, 0], sizes = [1, 16], strides = [1, 1]} : vector<16x16xf32> to vector<1x16xf32>
    %106 = vector.extract_strided_slice %95 {offsets = [10, 0], sizes = [1, 16], strides = [1, 1]} : vector<16x16xf32> to vector<1x16xf32>
    %107 = vector.extract_strided_slice %95 {offsets = [11, 0], sizes = [1, 16], strides = [1, 1]} : vector<16x16xf32> to vector<1x16xf32>
    %108 = vector.extract_strided_slice %95 {offsets = [12, 0], sizes = [1, 16], strides = [1, 1]} : vector<16x16xf32> to vector<1x16xf32>
    %109 = vector.extract_strided_slice %95 {offsets = [13, 0], sizes = [1, 16], strides = [1, 1]} : vector<16x16xf32> to vector<1x16xf32>
    %110 = vector.extract_strided_slice %95 {offsets = [14, 0], sizes = [1, 16], strides = [1, 1]} : vector<16x16xf32> to vector<1x16xf32>
    %111 = vector.extract_strided_slice %95 {offsets = [15, 0], sizes = [1, 16], strides = [1, 1]} : vector<16x16xf32> to vector<1x16xf32>
    %112 = tpu.concatenate %96, %97, %98, %99, %100, %101, %102, %103, %104, %105, %106, %107, %108, %109, %110, %111 in 1 : vector<1x16xf32>, vector<1x16xf32>, vector<1x16xf32>, vector<1x16xf32>, vector<1x16xf32>, vector<1x16xf32>, vector<1x16xf32>, vector<1x16xf32>, vector<1x16xf32>, vector<1x16xf32>, vector<1x16xf32>, vector<1x16xf32>, vector<1x16xf32>, vector<1x16xf32>, vector<1x16xf32>, vector<1x16xf32> -> vector<1x256xf32>
    %113 = vector.extract_strided_slice %94 {offsets = [0, 16], sizes = [16, 16], strides = [1, 1]} : vector<16x64xf32> to vector<16x16xf32>
    %114 = vector.extract_strided_slice %113 {offsets = [0, 0], sizes = [1, 16], strides = [1, 1]} : vector<16x16xf32> to vector<1x16xf32>
    %115 = vector.extract_strided_slice %113 {offsets = [1, 0], sizes = [1, 16], strides = [1, 1]} : vector<16x16xf32> to vector<1x16xf32>
    %116 = vector.extract_strided_slice %113 {offsets = [2, 0], sizes = [1, 16], strides = [1, 1]} : vector<16x16xf32> to vector<1x16xf32>
    %117 = vector.extract_strided_slice %113 {offsets = [3, 0], sizes = [1, 16], strides = [1, 1]} : vector<16x16xf32> to vector<1x16xf32>
    %118 = vector.extract_strided_slice %113 {offsets = [4, 0], sizes = [1, 16], strides = [1, 1]} : vector<16x16xf32> to vector<1x16xf32>
    %119 = vector.extract_strided_slice %113 {offsets = [5, 0], sizes = [1, 16], strides = [1, 1]} : vector<16x16xf32> to vector<1x16xf32>
    %120 = vector.extract_strided_slice %113 {offsets = [6, 0], sizes = [1, 16], strides = [1, 1]} : vector<16x16xf32> to vector<1x16xf32>
    %121 = vector.extract_strided_slice %113 {offsets = [7, 0], sizes = [1, 16], strides = [1, 1]} : vector<16x16xf32> to vector<1x16xf32>
    %122 = vector.extract_strided_slice %113 {offsets = [8, 0], sizes = [1, 16], strides = [1, 1]} : vector<16x16xf32> to vector<1x16xf32>
    %123 = vector.extract_strided_slice %113 {offsets = [9, 0], sizes = [1, 16], strides = [1, 1]} : vector<16x16xf32> to vector<1x16xf32>
    %124 = vector.extract_strided_slice %113 {offsets = [10, 0], sizes = [1, 16], strides = [1, 1]} : vector<16x16xf32> to vector<1x16xf32>
    %125 = vector.extract_strided_slice %113 {offsets = [11, 0], sizes = [1, 16], strides = [1, 1]} : vector<16x16xf32> to vector<1x16xf32>
    %126 = vector.extract_strided_slice %113 {offsets = [12, 0], sizes = [1, 16], strides = [1, 1]} : vector<16x16xf32> to vector<1x16xf32>
    %127 = vector.extract_strided_slice %113 {offsets = [13, 0], sizes = [1, 16], strides = [1, 1]} : vector<16x16xf32> to vector<1x16xf32>
    %128 = vector.extract_strided_slice %113 {offsets = [14, 0], sizes = [1, 16], strides = [1, 1]} : vector<16x16xf32> to vector<1x16xf32>
    %129 = vector.extract_strided_slice %113 {offsets = [15, 0], sizes = [1, 16], strides = [1, 1]} : vector<16x16xf32> to vector<1x16xf32>
    %130 = tpu.concatenate %114, %115, %116, %117, %118, %119, %120, %121, %122, %123, %124, %125, %126, %127, %128, %129 in 1 : vector<1x16xf32>, vector<1x16xf32>, vector<1x16xf32>, vector<1x16xf32>, vector<1x16xf32>, vector<1x16xf32>, vector<1x16xf32>, vector<1x16xf32>, vector<1x16xf32>, vector<1x16xf32>, vector<1x16xf32>, vector<1x16xf32>, vector<1x16xf32>, vector<1x16xf32>, vector<1x16xf32>, vector<1x16xf32> -> vector<1x256xf32>
    %131 = vector.extract_strided_slice %94 {offsets = [0, 32], sizes = [16, 16], strides = [1, 1]} : vector<16x64xf32> to vector<16x16xf32>
    %132 = vector.extract_strided_slice %131 {offsets = [0, 0], sizes = [1, 16], strides = [1, 1]} : vector<16x16xf32> to vector<1x16xf32>
    %133 = vector.extract_strided_slice %131 {offsets = [1, 0], sizes = [1, 16], strides = [1, 1]} : vector<16x16xf32> to vector<1x16xf32>
    %134 = vector.extract_strided_slice %131 {offsets = [2, 0], sizes = [1, 16], strides = [1, 1]} : vector<16x16xf32> to vector<1x16xf32>
    %135 = vector.extract_strided_slice %131 {offsets = [3, 0], sizes = [1, 16], strides = [1, 1]} : vector<16x16xf32> to vector<1x16xf32>
    %136 = vector.extract_strided_slice %131 {offsets = [4, 0], sizes = [1, 16], strides = [1, 1]} : vector<16x16xf32> to vector<1x16xf32>
    %137 = vector.extract_strided_slice %131 {offsets = [5, 0], sizes = [1, 16], strides = [1, 1]} : vector<16x16xf32> to vector<1x16xf32>
    %138 = vector.extract_strided_slice %131 {offsets = [6, 0], sizes = [1, 16], strides = [1, 1]} : vector<16x16xf32> to vector<1x16xf32>
    %139 = vector.extract_strided_slice %131 {offsets = [7, 0], sizes = [1, 16], strides = [1, 1]} : vector<16x16xf32> to vector<1x16xf32>
    %140 = vector.extract_strided_slice %131 {offsets = [8, 0], sizes = [1, 16], strides = [1, 1]} : vector<16x16xf32> to vector<1x16xf32>
    %141 = vector.extract_strided_slice %131 {offsets = [9, 0], sizes = [1, 16], strides = [1, 1]} : vector<16x16xf32> to vector<1x16xf32>
    %142 = vector.extract_strided_slice %131 {offsets = [10, 0], sizes = [1, 16], strides = [1, 1]} : vector<16x16xf32> to vector<1x16xf32>
    %143 = vector.extract_strided_slice %131 {offsets = [11, 0], sizes = [1, 16], strides = [1, 1]} : vector<16x16xf32> to vector<1x16xf32>
    %144 = vector.extract_strided_slice %131 {offsets = [12, 0], sizes = [1, 16], strides = [1, 1]} : vector<16x16xf32> to vector<1x16xf32>
    %145 = vector.extract_strided_slice %131 {offsets = [13, 0], sizes = [1, 16], strides = [1, 1]} : vector<16x16xf32> to vector<1x16xf32>
    %146 = vector.extract_strided_slice %131 {offsets = [14, 0], sizes = [1, 16], strides = [1, 1]} : vector<16x16xf32> to vector<1x16xf32>
    %147 = vector.extract_strided_slice %131 {offsets = [15, 0], sizes = [1, 16], strides = [1, 1]} : vector<16x16xf32> to vector<1x16xf32>
    %148 = tpu.concatenate %132, %133, %134, %135, %136, %137, %138, %139, %140, %141, %142, %143, %144, %145, %146, %147 in 1 : vector<1x16xf32>, vector<1x16xf32>, vector<1x16xf32>, vector<1x16xf32>, vector<1x16xf32>, vector<1x16xf32>, vector<1x16xf32>, vector<1x16xf32>, vector<1x16xf32>, vector<1x16xf32>, vector<1x16xf32>, vector<1x16xf32>, vector<1x16xf32>, vector<1x16xf32>, vector<1x16xf32>, vector<1x16xf32> -> vector<1x256xf32>
    %149 = vector.extract_strided_slice %94 {offsets = [0, 48], sizes = [16, 16], strides = [1, 1]} : vector<16x64xf32> to vector<16x16xf32>
    %150 = vector.extract_strided_slice %149 {offsets = [0, 0], sizes = [1, 16], strides = [1, 1]} : vector<16x16xf32> to vector<1x16xf32>
    %151 = vector.extract_strided_slice %149 {offsets = [1, 0], sizes = [1, 16], strides = [1, 1]} : vector<16x16xf32> to vector<1x16xf32>
    %152 = vector.extract_strided_slice %149 {offsets = [2, 0], sizes = [1, 16], strides = [1, 1]} : vector<16x16xf32> to vector<1x16xf32>
    %153 = vector.extract_strided_slice %149 {offsets = [3, 0], sizes = [1, 16], strides = [1, 1]} : vector<16x16xf32> to vector<1x16xf32>
    %154 = vector.extract_strided_slice %149 {offsets = [4, 0], sizes = [1, 16], strides = [1, 1]} : vector<16x16xf32> to vector<1x16xf32>
    %155 = vector.extract_strided_slice %149 {offsets = [5, 0], sizes = [1, 16], strides = [1, 1]} : vector<16x16xf32> to vector<1x16xf32>
    %156 = vector.extract_strided_slice %149 {offsets = [6, 0], sizes = [1, 16], strides = [1, 1]} : vector<16x16xf32> to vector<1x16xf32>
    %157 = vector.extract_strided_slice %149 {offsets = [7, 0], sizes = [1, 16], strides = [1, 1]} : vector<16x16xf32> to vector<1x16xf32>
    %158 = vector.extract_strided_slice %149 {offsets = [8, 0], sizes = [1, 16], strides = [1, 1]} : vector<16x16xf32> to vector<1x16xf32>
    %159 = vector.extract_strided_slice %149 {offsets = [9, 0], sizes = [1, 16], strides = [1, 1]} : vector<16x16xf32> to vector<1x16xf32>
    %160 = vector.extract_strided_slice %149 {offsets = [10, 0], sizes = [1, 16], strides = [1, 1]} : vector<16x16xf32> to vector<1x16xf32>
    %161 = vector.extract_strided_slice %149 {offsets = [11, 0], sizes = [1, 16], strides = [1, 1]} : vector<16x16xf32> to vector<1x16xf32>
    %162 = vector.extract_strided_slice %149 {offsets = [12, 0], sizes = [1, 16], strides = [1, 1]} : vector<16x16xf32> to vector<1x16xf32>
    %163 = vector.extract_strided_slice %149 {offsets = [13, 0], sizes = [1, 16], strides = [1, 1]} : vector<16x16xf32> to vector<1x16xf32>
    %164 = vector.extract_strided_slice %149 {offsets = [14, 0], sizes = [1, 16], strides = [1, 1]} : vector<16x16xf32> to vector<1x16xf32>
    %165 = vector.extract_strided_slice %149 {offsets = [15, 0], sizes = [1, 16], strides = [1, 1]} : vector<16x16xf32> to vector<1x16xf32>
    %166 = tpu.concatenate %150, %151, %152, %153, %154, %155, %156, %157, %158, %159, %160, %161, %162, %163, %164, %165 in 1 : vector<1x16xf32>, vector<1x16xf32>, vector<1x16xf32>, vector<1x16xf32>, vector<1x16xf32>, vector<1x16xf32>, vector<1x16xf32>, vector<1x16xf32>, vector<1x16xf32>, vector<1x16xf32>, vector<1x16xf32>, vector<1x16xf32>, vector<1x16xf32>, vector<1x16xf32>, vector<1x16xf32>, vector<1x16xf32> -> vector<1x256xf32>
    %167 = tpu.concatenate %112, %130, %148, %166 in 0 : vector<1x256xf32>, vector<1x256xf32>, vector<1x256xf32>, vector<1x256xf32> -> vector<4x256xf32>
    %168 = arith.truncf %167 : vector<4x256xf32> to vector<4x256xbf16>
    %c0_26 = arith.constant 0 : index
    %c0_27 = arith.constant 0 : index
    %169 = vector.load %arg6[%c0_26, %c0_27] : memref<256x32xbf16, #tpu.memory_space<vmem>>, vector<256x32xbf16>
    %cst_28 = arith.constant dense<0.000000e+00> : vector<4x32xf32>
    %170 = tpu.matmul %168, %169, %cst_28 {dimension_numbers = #tpu.dot_dimension_numbers<[1], [0], [0], [1], [0, 0, 1, 1], [], []>} : vector<4x256xbf16>, vector<256x32xbf16>, vector<4x32xf32> -> vector<4x32xf32>
    %c0_29 = arith.constant 0 : index
    %c0_30 = arith.constant 0 : index
    %171 = vector.load %arg7[%c0_29, %c0_30] : memref<1x32xf32, #tpu.memory_space<vmem>>, vector<1x32xf32>
    %172 = vector.broadcast %171 : vector<1x32xf32> to vector<4x32xf32>
    %173 = arith.addf %170, %172 : vector<4x32xf32>
    %cst_31 = arith.constant dense<0.000000e+00> : vector<4xf32>
    %174 = vector.multi_reduction <add>, %173, %cst_31 [1] : vector<4x32xf32> to vector<4xf32>
    %175 = vector.shape_cast %174 : vector<4xf32> to vector<4x1xf32>
    %cst_32 = arith.constant 3.200000e+01 : f32
    %176 = vector.broadcast %cst_32 : f32 to vector<4x1xf32>
    %177 = arith.divf %175, %176 : vector<4x1xf32>
    %178 = vector.broadcast %177 : vector<4x1xf32> to vector<4x32xf32>
    %179 = arith.subf %173, %178 : vector<4x32xf32>
    %180 = arith.mulf %179, %179 : vector<4x32xf32>
    %cst_33 = arith.constant dense<0.000000e+00> : vector<4xf32>
    %181 = vector.multi_reduction <add>, %180, %cst_33 [1] : vector<4x32xf32> to vector<4xf32>
    %182 = vector.shape_cast %181 : vector<4xf32> to vector<4x1xf32>
    %cst_34 = arith.constant 3.200000e+01 : f32
    %183 = vector.broadcast %cst_34 : f32 to vector<4x1xf32>
    %184 = arith.divf %182, %183 : vector<4x1xf32>
    %185 = vector.broadcast %177 : vector<4x1xf32> to vector<4x32xf32>
    %186 = arith.subf %173, %185 : vector<4x32xf32>
    %cst_35 = arith.constant 9.99999974E-6 : f32
    %187 = vector.broadcast %cst_35 : f32 to vector<4x1xf32>
    %188 = arith.addf %184, %187 : vector<4x1xf32>
    %189 = math.rsqrt %188 : vector<4x1xf32>
    %190 = vector.broadcast %189 : vector<4x1xf32> to vector<4x32xf32>
    %191 = arith.mulf %186, %190 : vector<4x32xf32>
    %cst_36 = arith.constant 0.000000e+00 : f32
    %192 = vector.broadcast %cst_36 : f32 to vector<4x32xf32>
    %193 = arith.cmpf ogt, %191, %192 : vector<4x32xf32>
    %cst_37 = arith.constant 0.00999999977 : f32
    %194 = vector.broadcast %cst_37 : f32 to vector<4x32xf32>
    %195 = arith.mulf %194, %191 : vector<4x32xf32>
    %196 = arith.select %193, %191, %195 : vector<4x32xi1>, vector<4x32xf32>
    %c0_38 = arith.constant 0 : index
    %c0_39 = arith.constant 0 : index
    %c0_40 = arith.constant 0 : index
    %197 = vector.load %arg8[%c0_38, %c0_39, %c0_40] : memref<1x4x32xf32, #tpu.memory_space<vmem>>, vector<1x4x32xf32>
    %198 = vector.shape_cast %197 : vector<1x4x32xf32> to vector<4x32xf32>
    %199 = arith.mulf %196, %198 : vector<4x32xf32>
    %cst_41 = arith.constant 1.53846157 : f32
    %200 = vector.broadcast %cst_41 : f32 to vector<4x32xf32>
    %201 = arith.mulf %199, %200 : vector<4x32xf32>
    %202 = arith.truncf %201 : vector<4x32xf32> to vector<4x32xbf16>
    %c0_42 = arith.constant 0 : index
    %c0_43 = arith.constant 0 : index
    %203 = vector.load %arg9[%c0_42, %c0_43] : memref<32x8xbf16, #tpu.memory_space<vmem>>, vector<32x8xbf16>
    %cst_44 = arith.constant dense<0.000000e+00> : vector<4x8xf32>
    %204 = tpu.matmul %202, %203, %cst_44 {dimension_numbers = #tpu.dot_dimension_numbers<[1], [0], [0], [1], [0, 0, 1, 1], [], []>} : vector<4x32xbf16>, vector<32x8xbf16>, vector<4x8xf32> -> vector<4x8xf32>
    %c0_45 = arith.constant 0 : index
    %c0_46 = arith.constant 0 : index
    %205 = vector.load %arg10[%c0_45, %c0_46] : memref<1x8xf32, #tpu.memory_space<vmem>>, vector<1x8xf32>
    %206 = vector.broadcast %205 : vector<1x8xf32> to vector<4x8xf32>
    %207 = arith.addf %204, %206 : vector<4x8xf32>
    %cst_47 = arith.constant dense<0.000000e+00> : vector<4xf32>
    %208 = vector.multi_reduction <add>, %207, %cst_47 [1] : vector<4x8xf32> to vector<4xf32>
    %209 = vector.shape_cast %208 : vector<4xf32> to vector<4x1xf32>
    %cst_48 = arith.constant 8.000000e+00 : f32
    %210 = vector.broadcast %cst_48 : f32 to vector<4x1xf32>
    %211 = arith.divf %209, %210 : vector<4x1xf32>
    %212 = vector.broadcast %211 : vector<4x1xf32> to vector<4x8xf32>
    %213 = arith.subf %207, %212 : vector<4x8xf32>
    %214 = arith.mulf %213, %213 : vector<4x8xf32>
    %cst_49 = arith.constant dense<0.000000e+00> : vector<4xf32>
    %215 = vector.multi_reduction <add>, %214, %cst_49 [1] : vector<4x8xf32> to vector<4xf32>
    %216 = vector.shape_cast %215 : vector<4xf32> to vector<4x1xf32>
    %cst_50 = arith.constant 8.000000e+00 : f32
    %217 = vector.broadcast %cst_50 : f32 to vector<4x1xf32>
    %218 = arith.divf %216, %217 : vector<4x1xf32>
    %219 = vector.broadcast %211 : vector<4x1xf32> to vector<4x8xf32>
    %220 = arith.subf %207, %219 : vector<4x8xf32>
    %cst_51 = arith.constant 9.99999974E-6 : f32
    %221 = vector.broadcast %cst_51 : f32 to vector<4x1xf32>
    %222 = arith.addf %218, %221 : vector<4x1xf32>
    %223 = math.rsqrt %222 : vector<4x1xf32>
    %224 = vector.broadcast %223 : vector<4x1xf32> to vector<4x8xf32>
    %225 = arith.mulf %220, %224 : vector<4x8xf32>
    %c0_52 = arith.constant 0 : index
    %c0_53 = arith.constant 0 : index
    %c0_54 = arith.constant 0 : index
    %226 = vector.load %arg11[%c0_52, %c0_53, %c0_54] : memref<1x4x8xf32, #tpu.memory_space<vmem>>, vector<1x4x8xf32>
    %227 = vector.shape_cast %226 : vector<1x4x8xf32> to vector<4x8xf32>
    %228 = vector.shape_cast %225 : vector<4x8xf32> to vector<1x4x8xf32>
    tpu.vector_store %arg11[%c0_52, %c0_53, %c0_54], %228 {strides = array<i32>} : memref<1x4x8xf32, #tpu.memory_space<vmem>>, vector<1x4x8xf32>,
    return
  }
  func.func @transform_0(%arg0: i32) -> (i32, i32, i32) {
    %c0_i32 = arith.constant 0 : i32
    %c0_i32_0 = arith.constant 0 : i32
    %c0_i32_1 = arith.constant 0 : i32
    return %arg0, %c0_i32, %c0_i32_0 : i32, i32, i32
  }
  func.func @transform_1(%arg0: i32) -> (i32, i32, i32) {
    %c0_i32 = arith.constant 0 : i32
    %c0_i32_0 = arith.constant 0 : i32
    %c0_i32_1 = arith.constant 0 : i32
    return %arg0, %c0_i32, %c0_i32_0 : i32, i32, i32
  }
  func.func @transform_2(%arg0: i32) -> (i32, i32) {
    %c0_i32 = arith.constant 0 : i32
    %c0_i32_0 = arith.constant 0 : i32
    %c0_i32_1 = arith.constant 0 : i32
    return %c0_i32, %c0_i32_0 : i32, i32
  }
  func.func @transform_3(%arg0: i32) -> (i32, i32) {
    %c0_i32 = arith.constant 0 : i32
    %c0_i32_0 = arith.constant 0 : i32
    %c0_i32_1 = arith.constant 0 : i32
    return %c0_i32, %c0_i32_0 : i32, i32
  }
  func.func @transform_4(%arg0: i32) -> (i32, i32) {
    %c0_i32 = arith.constant 0 : i32
    %c0_i32_0 = arith.constant 0 : i32
    %c0_i32_1 = arith.constant 0 : i32
    return %c0_i32, %c0_i32_0 : i32, i32
  }
  func.func @transform_5(%arg0: i32) -> (i32, i32) {
    %c0_i32 = arith.constant 0 : i32
    %c0_i32_0 = arith.constant 0 : i32
    %c0_i32_1 = arith.constant 0 : i32
    return %c0_i32, %c0_i32_0 : i32, i32
  }
  func.func @transform_6(%arg0: i32) -> (i32, i32) {
    %c0_i32 = arith.constant 0 : i32
    %c0_i32_0 = arith.constant 0 : i32
    %c0_i32_1 = arith.constant 0 : i32
    return %c0_i32, %c0_i32_0 : i32, i32
  }
  func.func @transform_7(%arg0: i32) -> (i32, i32, i32) {
    %c0_i32 = arith.constant 0 : i32
    %c0_i32_0 = arith.constant 0 : i32
    %c0_i32_1 = arith.constant 0 : i32
    return %arg0, %c0_i32, %c0_i32_0 : i32, i32, i32
  }
  func.func @transform_8(%arg0: i32) -> (i32, i32) {
    %c0_i32 = arith.constant 0 : i32
    %c0_i32_0 = arith.constant 0 : i32
    %c0_i32_1 = arith.constant 0 : i32
    return %c0_i32, %c0_i32_0 : i32, i32
  }
  func.func @transform_9(%arg0: i32) -> (i32, i32) {
    %c0_i32 = arith.constant 0 : i32
    %c0_i32_0 = arith.constant 0 : i32
    %c0_i32_1 = arith.constant 0 : i32
    return %c0_i32, %c0_i32_0 : i32, i32
  }
  func.func @transform_10(%arg0: i32) -> (i32, i32, i32) {
    %c0_i32 = arith.constant 0 : i32
    %c0_i32_0 = arith.constant 0 : i32
    %c0_i32_1 = arith.constant 0 : i32
    return %arg0, %c0_i32, %c0_i32_0 : i32, i32, i32
  }
}

</mosaic_0001>

<bundles_post_ra>
// kernel: tpu_custom_call.1
= control target key start
LH: loop header
LB: loop body
LE: loop exit
PB: predicated region body
PF: predicated region fallthrough
CT: control target
= control target key end

     0   :  { %s2944_s0 = inlined_call_operand.vmem [shape: bf16[2,64,256], index: 0, kind: input, shape index: {}]   ;;  %s2945_s1 = inlined_call_operand.vmem [shape: f32[2,8,64], index: 1, kind: input, shape index: {}]   ;;  %s2946_s2 = inlined_call_operand.hbm [shape: f32[64,64], index: 2, kind: input, shape index: {}]   ;;  %s2947_s3 = inlined_call_operand.vmem [shape: bf16[8,56], index: 3, kind: input, shape index: {}]   ;;  %s2948_s4 = inlined_call_operand.vmem [shape: bf16[16,56], index: 4, kind: input, shape index: {}]   ;;  %s2949_s5 = inlined_call_operand.vmem [shape: bf16[256,32], index: 5, kind: input, shape index: {}]   ;;  %s2950_s6 = inlined_call_operand.vmem [shape: f32[1,32], index: 6, kind: input, shape index: {}]   ;;  %s2951_s7 = inlined_call_operand.vmem [shape: f32[2,4,32], index: 7, kind: input, shape index: {}]   ;;  %s2952_s8 = inlined_call_operand.vmem [shape: bf16[32,8], index: 8, kind: input, shape index: {}]   ;;  %s2953_s9 = inlined_call_operand.vmem [shape: f32[1,8], index: 9, kind: input, shape index: {}]   ;;  %s2954_s10 = inlined_call_operand.hbm [shape: f32[2,4,8], index: 10, kind: output, shape index: {}]  }
   0x1   :  { %2965 = sst [smem:[#allocation8_spill]] %s2944_s0 }
   0x2   :  { %2966 = sst [smem:[#allocation9_spill]] %s2945_s1 }
   0x3   :  { %15 = vsyncpa [#allocation3], 0 }
   0x4   :  { %16 = vsyncpa [#allocation4], 0 }
   0x5   :  { %18 = vsyncpa [#allocation4 + $0x1], 0  ;;  %s2398_s13 = smov 0   ;;  %s2400_s14 = smov 0  }
   0x6   :  { %s2402_s15 = smov 0   ;;  %s2404_s16 = smov 0  }
   0x7 LB: > { %s2419_s17 = sadd.s32 4294967295, %s2327_s16   ;;  %s1757_s18 = sadd.s32 4294967294, %s2327_s16   ;;  %s2327_s16 = sphi %s2404_s16, %s2983_s16   ;;  %s2323_s15 = sphi %s2402_s15, %s2982_s15   ;;  %s2319_s14 = sphi %s2400_s14, %s2981_s14   ;;  %s2315_s13 = sphi %s2398_s13, %s2980_s13  }
   0x8   : > { %s2423_s19 = sadd.s32 1, %s2327_s16   ;;  %s256_s20 = sadd.s32 1, %s2323_s15 }
   0x9   : > { %s253_s21 = ssub.s32 %s2327_s16, %s2423_s19  ;;  %p266_p0 = scmp.ne.s32.totalorder %s2323_s15, %s2319_s14 }
   0xa   : > { %p254_p1 = scmp.eq.s32.totalorder %s253_s21, 0  ;;  %p267_p2 = scmp.eq.s32.totalorder %s2419_s17, 1 }
   0xb   : > { %p272_p3 = scmp.ne.s32.totalorder %s2319_s14, %s2315_s13  ;;  %p273_p4 = scmp.eq.s32.totalorder %s1757_s18, 1 }
   0xc   : > { %s2434_s22 = scalar_select %p254_p1, %s2323_s15, %s256_s20  }
   0xd   : > { %p2436_p5 = por %p267_p2, %p266_p0  ;;  %p2440_p6 = por %p273_p4, %p272_p3 }
   0xe   : > { %p1758_p7 = scmp.ge.s32.totalorder %s2327_s16, 1  ;;  %p280_p8 = scmp.lt.s32.totalorder %s2327_s16, 3 }
   0xf   : > { %s2968_s24 = scalar_select %p2440_p6, 1, 0 }
  0x10   : > { %p2008_p9 = scmp.eq.s32.totalorder %s2419_s17, 0  ;;  %p2447_p10 = pnand %p1758_p7, %p280_p8 }
  0x11   : > { %s2329_s26 = smov [#allocation2]  }
  0x12   : > { %s292_s27 = sshll.u32 %s2329_s26, 4  ;;  %p2000_p11 = pneg %p2447_p10  ;;  %s293_s27 = int_to_ptr.vmem [resolvable:$true] %s292_s27 }
  0x13   : > { %s2248_s28 = scalar_lea.vmem %s293_s27, 1024  ;;  %p2256_p3 = scmp.lt.s32.totalorder %s293_s27, %s293_s27 }
  0x14   : > { %p2001_p12 = pnand %p2008_p9, %p2000_p11  ;;  %p2249_p0 = scmp.ne.s32.totalorder %s293_s27, %s2248_s28 }
  0x15   : > { %p2257_p4 = scmp.lt.s32.totalorder %s2248_s28, %s2248_s28 }
  0x16   : > { %p2239_p13 = pneg %p2001_p12 }
  0x17   : > { %p2258_p6 = por %p2257_p4, %p2256_p3 }
  0x18   : > { %p2251_p1 = pnand %p2249_p0, %p2239_p13 }
  0x1a   : > { %p2252_p2 = pneg %p2251_p1 }
  0x1c   : > { %p2259_p7 = pnand %p2258_p6, %p2252_p2 }
  0x1e   : > { %2262 = shalt.err (!%p2259_p7)
}
  0x1f   : > { %s2330_s29 = smov 128   ;;  %s2331_s30 = smov 8  }
  0x20   : > { %2003 = dma.hbm_to_vmem [thread:$0]  (!%p2001_p12), %s2946_s2, 1024, %s293_s27, [#allocation3], %s2330_s29, %s2330_s29, %s2331_s30  }
  0x21   : > { %348 = sbr.rel (%p2447_p10) target bundleno = 3632 (0xe30), region = 60 }
  0x26   : > { %2306 = dma.done.wait (%p2008_p9), [#allocation3], 1024  }
  0x27   : > { %2308 = vsyncadd (%p2008_p9), [#allocation3], 4294966272  ;;  %p394_p8 = scmp.lt.s32.totalorder %s2419_s17, 1  ;;  %v2332_v0 = vmov 0   ;;  %s2970_s0 = sld [smem:[#allocation8_spill]]  ;;  %vm466_vm0 = vcmask 523264  }
  0x28   : > { %502 = vmatprep.mubr.bf16.mxu1 %v2332_v0  ;;  %s2971_s1 = sld [smem:[#allocation9_spill]]  ;;  %s2959_s11 = smov 64   ;;  %v2334_v21 = vmov 0.0   ;;  %vm2335_vm1 = vmmov 0   ;;  %v2519_v30 = vld [vmem:[#allocation2 + $0x38] sm:$0xff]  ;;  %v2521_v31 = vld [vmem:[#allocation2 + $0x30] sm:$0xff] }
  0x29   : > { %s2467_s18 = scalar_select %p394_p8, %s2419_s17, 1  ;;  %1898 = vmatprep.subr.mxu0 %v2334_v21  ;;  %1914 = vmatprep.mubr.msk.f32.mxu0 %vm2335_vm1, %v2334_v21  ;;  %v2525_v32 = vld [vmem:[#allocation2 + $0x28] sm:$0xff]  ;;  %v2529_v33 = vld [vmem:[#allocation2 + $0x20] sm:$0xff]  ;;  %v2533_v34 = vld [vmem:[#allocation2 + $0x18] sm:$0xff]  ;;  %vm566_vm2 = vcmask 1043456   ;;  %vm562_vm3 = vcmask 457728  }
  0x2a   : > { %1899 = vmatpush3.msra.mxu0 %v2519_v30  ;;  %v2537_v35 = vld [vmem:[#allocation2 + $0x10] sm:$0xff]  ;;  %v2541_v36 = vld [vmem:[#allocation2 + $0x8] sm:$0xff]  ;;  %v557_v53 = vld [vmem:[%s2947_s3] sm:$0xf]  ;;  %s2964_s28 = smov 32   ;;  %s2962_s29 = smov 96  }
  0x2b   : > { %s1812_s20 = sshll.u32 %s2467_s18, 6  ;;  %s1766_s27 = sshll.u32 %s2467_s18, 3  ;;  %1900 = vmatprep.subr.mxu0 %v2334_v21  ;;  %v2573_v54 = vld [vmem:[#allocation2] sm:$0xff]  ;;  %vm1146_vm7 = vcmask 130048   ;;  %vm1148_vm8 = vcmask 261120   ;;  %vm1150_vm9 = vcmask 392192  }
  0x2c   : > { %1901 = vmatpush3.msra.mxu0 %v2521_v31  ;;  %s2957_s12 = smov 80   ;;  %s2977_s25 = smov 96   ;;  %vm1153_vm10 = vcmask 654336   ;;  %vm1155_vm11 = vcmask 785408   ;;  %vm1157_vm12 = vcmask 916480   ;;  %vm1358_vm13 = vcmask 1040384  }
  0x2d   : > { %s398_s26 = scalar_lea.vmem %s2970_s0, %s1812_s20  ;;  %1902 = vmatprep.subr.mxu0 %v2334_v21  ;;  %s2972_s20 = smov 64   ;;  %vm1361_vm14 = vcmask 1041408   ;;  %vm1364_vm15 = vcmask 1042432  }
  0x2e   : > { %v2473_v1 = vld [vmem:[%s398_s26 + $0x34] ss:$8 sps:$4 sm:$0xff]   ;;  %v2475_v2 = vld [vmem:[%s398_s26 + $0x30] ss:$8 sps:$4 sm:$0xff]   ;;  %v2478_v3 = vld [vmem:[%s398_s26 + $0x24] ss:$8 sps:$4 sm:$0xff]   ;;  %s402_s30 = scalar_lea.vmem %s2971_s1, %s1766_s27  ;;  %1903 = vmatpush3.msra.mxu0 %v2525_v32 }
  0x2f   : > { %478 = vmatprep.subr.bf16.mxu1 %v2473_v1  ;;  %v2481_v4 = vld [vmem:[%s398_s26 + $0x20] ss:$8 sps:$4 sm:$0xff]   ;;  %v2485_v5 = vld [vmem:[%s398_s26 + $0x14] ss:$8 sps:$4 sm:$0xff]   ;;  %v2487_v6 = vld [vmem:[%s398_s26 + $0x10] ss:$8 sps:$4 sm:$0xff]   ;;  %1904 = vmatprep.subr.mxu0 %v2334_v21 }
  0x30   : > { %479 = vmatpush1.bf16.msra.mxu1 %v2475_v2  ;;  %v2489_v7 = vld [vmem:[%s398_s26 + $0x4] ss:$8 sps:$4 sm:$0xff]   ;;  %v2496_v8 = vld [vmem:[%s398_s26] ss:$8 sps:$4 sm:$0xff]   ;;  %1905 = vmatpush3.msra.mxu0 %v2529_v33  ;;  %s2963_s26 = smov 16   ;;  %s2961_s27 = smov 112  }
  0x31   : > { %480 = vmatprep.subr.bf16.mxu1 %v2478_v3  ;;  %v2498_v9 = vld [vmem:[%s402_s30] sm:$0xff]  ;;  %1906 = vmatprep.subr.mxu0 %v2334_v21  ;;  %s2955_s30 = smov 48   ;;  %s2976_s0 = smov 32  }
  0x32   : > { %v425_v10 = vpack.c.bf16 %v2498_v9, %v2498_v9  ;;  %1907 = vmatpush3.msra.mxu0 %v2533_v34  ;;  %s2978_s1 = smov 112  }
  0x33   : > { %1908 = vmatprep.subr.mxu0 %v2334_v21 }
  0x34   : > { %481 = vmatpush1.bf16.msra.mxu1 %v2481_v4  ;;  %1909 = vmatpush3.msra.mxu0 %v2537_v35 }
  0x35   : > { %482 = vmatprep.subr.bf16.mxu1 %v2485_v5  ;;  %1910 = vmatprep.subr.mxu0 %v2334_v21 }
  0x36   : > { %1911 = vmatpush3.msra.mxu0 %v2541_v36 }
  0x37   : > { %1912 = vmatprep.subr.mxu0 %v2334_v21 }
  0x38   : > { %483 = vmatpush1.bf16.msra.mxu1 %v2487_v6  ;;  %1913 = vmatpush3.msra.mxu0 %v2573_v54 }
  0x39   : > { %484 = vmatprep.subr.bf16.mxu1 %v2489_v7  ;;  %775 = vmatprep.subr.bf16.mxu0 %v2473_v1 }
  0x3c   : > { %485 = vmatpush1.bf16.msra.mxu1 %v2496_v8 }
  0x3d   : > { %1886 = vmatprep.subr.bf16.mxu1 %v2334_v21 }
  0x3f   : > { %1776 = vmatmul.mubr.msk.bf16.vlgmr.msra.gmra.mxu1 %vm466_vm0, %v425_v10 }
  0x40   : > { %1894 = vmatprep.mubr.msk.bf16.mxu1 %vm2335_vm1, %v2334_v21 }
  0xff   : > { %v504_v11 = vpop.f32.mrf.mxu1 }
 0x100   : > { %515 = vrot.lane.b32.xlu0 %v504_v11, %s2959_s11 }
 0x101   : > { %v506_v12 = vpop.f32.mrf.mxu1 }
 0x102   : > { %v512_v27 = vsub.f32 %v504_v11, %v506_v12  ;;  %v511_v29 = vadd.f32 %v506_v12, %v504_v11 }
 0x103   : > { %v508_v13 = vpop.f32.mrf.mxu1 }
 0x104   : > { %521 = vrot.lane.b32.xlu0 %v506_v12, %s2959_s11  ;;  %v513_v28 = vand.u32 2147483647, %v512_v27  ;;  %v558_v52 = vpack.c.bf16 %v511_v29, %v2498_v9 }
 0x105   : > { %v509_v14 = vpop.f32.mrf.mxu1 }
 0x172   : > { %v516_v15 = vpop.permute.xlu0 %515 }
 0x173   : > { %v518_v16 = vadd.f32 %v516_v15, %v504_v11 }
 0x175   : > { %v519_v17 = vadd.f32 %v518_v16, %v506_v12 }
 0x176   : > { %v522_v18 = vpop.permute.xlu0 %521 }
 0x177   : > { %v524_v19 = vadd.f32 %v522_v18, %v519_v17 }
 0x179   : > { %v525_v20 = vmul.f32 0.25, %v524_v19 }
 0x17b   : > { %528 = vrot.lane.b32.xlu1 %v525_v20, %s2959_s11  ;;  %v526_v37 = vsub.f32 %v504_v11, %v525_v20  ;;  %v532_v38 = vsub.f32 %v506_v12, %v525_v20 }
 0x17d   : > { %v534_v39 = vmul.f32 %v526_v37, %v526_v37  ;;  %v541_v42 = vmul.f32 %v532_v38, %v532_v38 }
 0x1ed   : > { %v529_v22 = vpop.permute.xlu1 %528 }
 0x1ee   : > { %v531_v23 = vsub.f32 %v504_v11, %v529_v22  ;;  %v533_v24 = vsub.f32 %v506_v12, %v529_v22 }
 0x1f0   : > { %v535_v25 = vmul.f32 %v531_v23, %v531_v23  ;;  %v543_v26 = vmul.f32 %v533_v24, %v533_v24 }
 0x1f2   : > { %545 = vrot.lane.b32.xlu0 %v543_v26, %s2959_s11  ;;  %537 = vrot.lane.b32.xlu1 %v535_v25, %s2959_s11 }
 0x1f6   : > { %554 = vrot.lane.b32.xlu1 %v513_v28, %s2959_s11  ;;  %550 = vrot.lane.b32.xlu0 %v511_v29, %s2959_s11 }
 0x264   : > { %v538_v40 = vpop.permute.xlu1 %537  ;;  %v546_v44 = vpop.permute.xlu0 %545 }
 0x265   : > { %v540_v41 = vadd.f32 %v538_v40, %v534_v39 }
 0x267   : > { %v542_v43 = vadd.f32 %v541_v42, %v540_v41 }
 0x268   : > { %v555_v47 = vpop.permute.xlu1 %554  ;;  %v551_v50 = vpop.permute.xlu0 %550 }
 0x269   : > { %v548_v45 = vadd.f32 %v546_v44, %v542_v43  ;;  %v560_v49 = vpack.c.bf16 %v524_v19, %v555_v47  ;;  %v559_v51 = vpack.c.bf16 %v513_v28, %v551_v50 }
 0x26b   : > { %v561_v46 = vpack.c.bf16 %v548_v45, %v548_v45 }
 0x26d   : > { %v568_v48 = vsel %vm566_vm2, %v561_v46, 0 }
 0x26e   : > { %1887 = vmatpush3.bf16.msra.mxu1 %v568_v48 }
 0x26f   : > { %1888 = vmatprep.subr.bf16.mxu1 %v2334_v21 }
 0x272   : > { %1889 = vmatpush3.bf16.msra.mxu1 %v560_v49  ;;  %v2208_v49 = vld [vmem:[%s2948_s4] sm:$0xff]  }
 0x273   : > { %1890 = vmatprep.subr.bf16.mxu1 %v2334_v21 }
 0x276   : > { %1891 = vmatpush3.bf16.msra.mxu1 %v559_v51 }
 0x277   : > { %1892 = vmatprep.subr.bf16.mxu1 %v2334_v21 }
 0x27a   : > { %1893 = vmatpush3.bf16.msra.mxu1 %v558_v52 }
 0x27b   : > { %1917 = vmatprep.subr.mxu1 %v2334_v21 }
 0x27d   : > { %1895 = vmatmul.mubr.msk.bf16.vlgmr.msra.gmra.mxu1 %vm562_vm3, %v557_v53 }
 0x27e   : > { %1918 = vmatpush3.msra.mxu1 %v2519_v30  ;;  %1933 = vmatprep.mubr.msk.f32.mxu1 %vm2335_vm1, %v2334_v21 }
 0x27f   : > { %1919 = vmatprep.subr.mxu1 %v2334_v21 }
 0x280   : > { %1920 = vmatpush3.msra.mxu1 %v2521_v31 }
 0x281   : > { %1921 = vmatprep.subr.mxu1 %v2334_v21 }
 0x282   : > { %1922 = vmatpush3.msra.mxu1 %v2525_v32 }
 0x283   : > { %1923 = vmatprep.subr.mxu1 %v2334_v21 }
 0x284   : > { %1924 = vmatpush3.msra.mxu1 %v2529_v33 }
 0x285   : > { %1925 = vmatprep.subr.mxu1 %v2334_v21 }
 0x286   : > { %1926 = vmatpush3.msra.mxu1 %v2533_v34 }
 0x287   : > { %1927 = vmatprep.subr.mxu1 %v2334_v21 }
 0x288   : > { %1928 = vmatpush3.msra.mxu1 %v2537_v35 }
 0x289   : > { %1929 = vmatprep.subr.mxu1 %v2334_v21 }
 0x28a   : > { %1930 = vmatpush3.msra.mxu1 %v2541_v36 }
 0x28b   : > { %1931 = vmatprep.subr.mxu1 %v2334_v21 }
 0x28c   : > { %1932 = vmatpush3.msra.mxu1 %v2573_v54 }
 0x28d   : > { %1936 = vmatprep.subr.bf16.mxu1 %v2334_v21 }
 0x33d   : > { %v604_v55 = vpop.f32.mrf.mxu1 }
 0x33e   : > { %1915 = vmatmul.mubr.msk.f32.vlgmr.msra.gmra.mxu0 %vm466_vm0, %v604_v55 }
 0x33f   : > { %v1896_v56 = vpop.f32.mrf.mxu1  ;;  %776 = vmatpush1.bf16.msra.mxu0 %v2475_v2  ;;  %799 = vmatprep.mubr.bf16.mxu0 %v2332_v0 }
 0x340   : > { %777 = vmatprep.subr.bf16.mxu0 %v2478_v3 }
 0x341   : > { %v607_v57 = vpop.f32.mrf.mxu1 }
 0x343   : > { %v1897_v58 = vpop.f32.mrf.mxu1  ;;  %778 = vmatpush1.bf16.msra.mxu0 %v2481_v4 }
 0x344   : > { %779 = vmatprep.subr.bf16.mxu0 %v2485_v5 }
 0x347   : > { %780 = vmatpush1.bf16.msra.mxu0 %v2487_v6 }
 0x348   : > { %781 = vmatprep.subr.bf16.mxu0 %v2489_v7 }
 0x34b   : > { %782 = vmatpush1.bf16.msra.mxu0 %v2496_v8 }
 0x34c   : > { %1948 = vmatprep.subr.mxu0 %v2519_v30 }
 0x3fe   : > { %v679_v59 = vpop.f32.mrf.mxu0 }
 0x3ff   : > { %v683_v60 = vsub.f32 %v604_v55, %v679_v59 }
 0x400   : > { %v1916_v61 = vpop.f32.mrf.mxu0 }
 0x401   : > { %v684_v62 = vmul.f32 %v683_v60, %v683_v60 }
 0x403   : > { %1934 = vmatmul.mubr.msk.f32.vlgmr.msra.gmra.mxu1 %vm466_vm0, %v684_v62 }
 0x404   : > { %1944 = vmatprep.mubr.msk.bf16.mxu1 %vm2335_vm1, %v2334_v21 }
 0x4c3   : > { %v754_v63 = vpop.f32.mrf.mxu1 }
 0x4c4   : > { %v755_v0 = vadd.f32 1e-05, %v754_v63 }
 0x4c5   : > { %v1935_v1 = vpop.f32.mrf.mxu1 }
 0x4c6   : > { %2227 = vrsqrt.f32 %v755_v0 }
 0x4d3   : > { %v2228_v2 = vpop.eup %2227 }
 0x4d4   : > { %v759_v3 = vmul.f32 %v2228_v2, %v683_v60 }
 0x4d6   : > { %vm760_vm4 = vcmp.gt.f32.partialorder %v759_v3, 0.0  ;;  %v761_v4 = vmul.f32 0.01, %v759_v3 }
 0x4d8   : > { %v2592_v5 = vsel %vm760_vm4, %v759_v3, %v761_v4 }
 0x4d9   : > { %v763_v6 = vpack.c.bf16 %v2592_v5, %v2592_v5 }
 0x4db   : > { %1780 = vmatmul.mubr.msk.bf16.vlgmr.msra.gmra.mxu0 %vm466_vm0, %v763_v6 }
 0x4dc   : > { %1949 = vmatpush3.msra.mxu0 %v2519_v30 }
 0x4dd   : > { %1950 = vmatprep.subr.mxu0 %v2521_v31 }
 0x4de   : > { %1951 = vmatpush3.msra.mxu0 %v2521_v31 }
 0x4df   : > { %1952 = vmatprep.subr.mxu0 %v2525_v32 }
 0x4e0   : > { %1953 = vmatpush3.msra.mxu0 %v2525_v32 }
 0x4e1   : > { %1954 = vmatprep.subr.mxu0 %v2529_v33 }
 0x4e2   : > { %1955 = vmatpush3.msra.mxu0 %v2529_v33 }
 0x4e3   : > { %1956 = vmatprep.subr.mxu0 %v2533_v34 }
 0x4e4   : > { %1957 = vmatpush3.msra.mxu0 %v2533_v34 }
 0x4e5   : > { %1958 = vmatprep.subr.mxu0 %v2537_v35 }
 0x4e6   : > { %1959 = vmatpush3.msra.mxu0 %v2537_v35 }
 0x4e7   : > { %1960 = vmatprep.subr.mxu0 %v2541_v36 }
 0x4e8   : > { %1961 = vmatpush3.msra.mxu0 %v2541_v36 }
 0x4e9   : > { %1962 = vmatprep.subr.mxu0 %v2573_v54 }
 0x4ea   : > { %1963 = vmatpush3.msra.mxu0 %v2573_v54 }
 0x59b   : > { %v801_v7 = vpop.f32.mrf.mxu0 }
 0x59c   : > { %812 = vrot.lane.b32.xlu1 %v801_v7, %s2959_s11 }
 0x59d   : > { %v803_v8 = vpop.f32.mrf.mxu0 }
 0x59e   : > { %818 = vrot.lane.b32.xlu0 %v803_v8, %s2959_s11  ;;  %v809_v23 = vsub.f32 %v801_v7, %v803_v8  ;;  %v808_v25 = vadd.f32 %v803_v8, %v801_v7 }
 0x59f   : > { %v805_v9 = vpop.f32.mrf.mxu0 }
 0x5a0   : > { %v810_v24 = vand.u32 2147483647, %v809_v23  ;;  %v856_v48 = vpack.c.bf16 %v808_v25, %v2592_v5  ;;  %v2211_v23 = vld [vmem:[%s2949_s5 + $0x70] sm:$0xff]  }
 0x5a1   : > { %v806_v10 = vpop.f32.mrf.mxu0 }
 0x60e   : > { %v813_v11 = vpop.permute.xlu1 %812 }
 0x60f   : > { %v815_v12 = vadd.f32 %v813_v11, %v801_v7 }
 0x610   : > { %v819_v14 = vpop.permute.xlu0 %818 }
 0x611   : > { %v816_v13 = vadd.f32 %v815_v12, %v803_v8 }
 0x613   : > { %v821_v15 = vadd.f32 %v819_v14, %v816_v13 }
 0x615   : > { %v822_v16 = vmul.f32 0.25, %v821_v15 }
 0x617   : > { %825 = vrot.lane.b32.xlu1 %v822_v16, %s2959_s11  ;;  %v823_v26 = vsub.f32 %v801_v7, %v822_v16  ;;  %v829_v27 = vsub.f32 %v803_v8, %v822_v16 }
 0x619   : > { %v831_v28 = vmul.f32 %v823_v26, %v823_v26  ;;  %v838_v38 = vmul.f32 %v829_v27, %v829_v27 }
 0x689   : > { %v826_v17 = vpop.permute.xlu1 %825 }
 0x68a   : > { %v828_v18 = vsub.f32 %v801_v7, %v826_v17  ;;  %v830_v19 = vsub.f32 %v803_v8, %v826_v17 }
 0x68c   : > { %v832_v20 = vmul.f32 %v828_v18, %v828_v18  ;;  %v840_v22 = vmul.f32 %v830_v19, %v830_v19  ;;  %v2209_v18 = vld [vmem:[%s2949_s5 + $0x78] sm:$0xff]  }
 0x68d   : > { %v2210_v19 = vld [vmem:[%s2949_s5 + $0x38] sm:$0xff]   ;;  %1861 = vmatprep.subr.bf16.mxu0 %v2209_v18 }
 0x68e   : > { %842 = vrot.lane.b32.xlu1 %v840_v22, %s2959_s11  ;;  %834 = vrot.lane.b32.xlu0 %v832_v20, %s2959_s11 }
 0x692   : > { %851 = vrot.lane.b32.xlu0 %v810_v24, %s2959_s11  ;;  %847 = vrot.lane.b32.xlu1 %v808_v25, %s2959_s11 }
 0x700   : > { %v835_v29 = vpop.permute.xlu0 %834  ;;  %v843_v40 = vpop.permute.xlu1 %842 }
 0x701   : > { %v837_v37 = vadd.f32 %v835_v29, %v831_v28  ;;  %v2213_v29 = vld [vmem:[%s2949_s5 + $0x68] sm:$0xff]  }
 0x703   : > { %v839_v39 = vadd.f32 %v838_v38, %v837_v37  ;;  %v2214_v37 = vld [vmem:[%s2949_s5 + $0x28] sm:$0xff]  }
 0x704   : > { %v852_v43 = vpop.permute.xlu0 %851  ;;  %v848_v46 = vpop.permute.xlu1 %847 }
 0x705   : > { %v845_v41 = vadd.f32 %v843_v40, %v839_v39  ;;  %v858_v45 = vpack.c.bf16 %v821_v15, %v852_v43  ;;  %v857_v47 = vpack.c.bf16 %v810_v24, %v848_v46  ;;  %v2212_v24 = vld [vmem:[%s2949_s5 + $0x30] sm:$0xff]   ;;  %v2215_v40 = vld [vmem:[%s2949_s5 + $0x60] sm:$0xff]  }
 0x707   : > { %v859_v42 = vpack.c.bf16 %v845_v41, %v845_v41  ;;  %v2216_v41 = vld [vmem:[%s2949_s5 + $0x20] sm:$0xff]  }
 0x709   : > { %v869_v44 = vsel %vm566_vm2, %v859_v42, 0  ;;  %vm1632_vm2 = vcmask 60416  }
 0x70a   : > { %1937 = vmatpush3.bf16.msra.mxu1 %v869_v44 }
 0x70b   : > { %1938 = vmatprep.subr.bf16.mxu1 %v2334_v21 }
 0x70e   : > { %1939 = vmatpush3.bf16.msra.mxu1 %v858_v45 }
 0x70f   : > { %1940 = vmatprep.subr.bf16.mxu1 %v2334_v21 }
 0x712   : > { %1941 = vmatpush3.bf16.msra.mxu1 %v857_v47  ;;  %v2217_v47 = vld [vmem:[%s2949_s5 + $0x58] sm:$0xff]  }
 0x713   : > { %1942 = vmatprep.subr.bf16.mxu1 %v2334_v21 }
 0x716   : > { %1943 = vmatpush3.bf16.msra.mxu1 %v856_v48  ;;  %v2218_v48 = vld [vmem:[%s2949_s5 + $0x18] sm:$0xff]  }
 0x717   : > { %1967 = vmatprep.subr.mxu1 %v2519_v30 }
 0x719   : > { %1945 = vmatmul.mubr.msk.bf16.vlgmr.msra.gmra.mxu1 %vm562_vm3, %v2208_v49 }
 0x71a   : > { %1968 = vmatpush3.msra.mxu1 %v2519_v30 }
 0x71b   : > { %1969 = vmatprep.subr.mxu1 %v2521_v31 }
 0x71c   : > { %1970 = vmatpush3.msra.mxu1 %v2521_v31 }
 0x71d   : > { %1971 = vmatprep.subr.mxu1 %v2525_v32 }
 0x71e   : > { %1972 = vmatpush3.msra.mxu1 %v2525_v32 }
 0x71f   : > { %1973 = vmatprep.subr.mxu1 %v2529_v33 }
 0x720   : > { %1974 = vmatpush3.msra.mxu1 %v2529_v33 }
 0x721   : > { %1975 = vmatprep.subr.mxu1 %v2533_v34 }
 0x722   : > { %1976 = vmatpush3.msra.mxu1 %v2533_v34 }
 0x723   : > { %1977 = vmatprep.subr.mxu1 %v2537_v35 }
 0x724   : > { %1978 = vmatpush3.msra.mxu1 %v2537_v35 }
 0x725   : > { %1979 = vmatprep.subr.mxu1 %v2541_v36 }
 0x726   : > { %1980 = vmatpush3.msra.mxu1 %v2541_v36 }
 0x727   : > { %1981 = vmatprep.subr.mxu1 %v2573_v54 }
 0x728   : > { %1982 = vmatpush3.msra.mxu1 %v2573_v54 }
 0x729   : > { %1986 = vmatprep.subr.bf16.mxu1 %v2334_v21 }
 0x7d9   : > { %v905_v30 = vpop.f32.mrf.mxu1 }
 0x7da   : > { %1964 = vmatprep.mubr.msk.f32.mxu0 %vm466_vm0, %v905_v30 }
 0x7db   : > { %v1946_v31 = vpop.f32.mrf.mxu1 }
 0x7dc   : > { %v2219_v31 = vld [vmem:[%s2949_s5 + $0x50] sm:$0xff]  }
 0x7dd   : > { %v908_v32 = vpop.f32.mrf.mxu1 }
 0x7de   : > { %1965 = vmatmul.mubr.msk.f32.vlgmr.msra.gmra.mxu0 %vm466_vm0, %v908_v32 }
 0x7df   : > { %v1947_v33 = vpop.f32.mrf.mxu1  ;;  %1862 = vmatpush3.bf16.msra.mxu0 %v2210_v19 }
 0x7e0   : > { %1863 = vmatprep.subr.bf16.mxu0 %v2211_v23 }
 0x7e3   : > { %1864 = vmatpush3.bf16.msra.mxu0 %v2212_v24 }
 0x7e4   : > { %1865 = vmatprep.subr.bf16.mxu0 %v2213_v29 }
 0x7e7   : > { %1866 = vmatpush3.bf16.msra.mxu0 %v2214_v37 }
 0x7e8   : > { %1867 = vmatprep.subr.bf16.mxu0 %v2215_v40 }
 0x7eb   : > { %1868 = vmatpush3.bf16.msra.mxu0 %v2216_v41 }
 0x7ec   : > { %1869 = vmatprep.subr.bf16.mxu0 %v2217_v47 }
 0x7ef   : > { %1870 = vmatpush3.bf16.msra.mxu0 %v2218_v48 }
 0x7f0   : > { %1871 = vmatprep.subr.bf16.mxu0 %v2219_v31 }
 0x89e   : > { %v1966_v34 = vpop.f32.mrf.mxu0 }
 0x89f   : > { %v994_v35 = vsub.f32 %v908_v32, %v1966_v34  ;;  %v2220_v32 = vld [vmem:[%s2949_s5 + $0x10] sm:$0xff]   ;;  %v2221_v34 = vld [vmem:[%s2949_s5 + $0x48] sm:$0xff]  }
 0x8a0   : > { %v984_v50 = vpop.f32.mrf.mxu0  ;;  %1872 = vmatpush3.bf16.msra.mxu0 %v2220_v32 }
 0x8a1   : > { %v993_v51 = vsub.f32 %v905_v30, %v984_v50  ;;  %v996_v36 = vmul.f32 %v994_v35, %v994_v35  ;;  %v2223_v50 = vld [vmem:[%s2949_s5 + $0x40] sm:$0xff]   ;;  %1873 = vmatprep.subr.bf16.mxu0 %v2221_v34 }
 0x8a3   : > { %v995_v52 = vmul.f32 %v993_v51, %v993_v51 }
 0x8a5   : > { %1983 = vmatprep.mubr.msk.f32.mxu1 %vm466_vm0, %v995_v52  ;;  %v2224_v52 = vld [vmem:[%s2949_s5] sm:$0xff]  }
 0x8a6   : > { %1984 = vmatmul.mubr.msk.f32.vlgmr.msra.gmra.mxu1 %vm466_vm0, %v996_v36 }
 0x8a7   : > { %1990 = vmatprep.mubr.msk.bf16.mxu1 %vm2335_vm1, %v2334_v21 }
 0x966   : > { %v1985_v53 = vpop.f32.mrf.mxu1 }
 0x967   : > { %v1075_v54 = vadd.f32 1e-05, %v1985_v53 }
 0x968   : > { %v1069_v55 = vpop.f32.mrf.mxu1 }
 0x969   : > { %2229 = vrsqrt.f32 %v1075_v54  ;;  %v1070_v56 = vadd.f32 1e-05, %v1069_v55 }
 0x96b   : > { %2231 = vrsqrt.f32 %v1070_v56 }
 0x976   : > { %v2230_v57 = vpop.eup %2229 }
 0x977   : > { %v1081_v58 = vmul.f32 %v2230_v57, %v994_v35  ;;  %v2222_v35 = vld [vmem:[%s2949_s5 + $0x8] sm:$0xff]  }
 0x978   : > { %v2232_v59 = vpop.eup %2231  ;;  %1874 = vmatpush3.bf16.msra.mxu0 %v2222_v35 }
 0x979   : > { %vm1083_vm5 = vcmp.gt.f32.partialorder %v1081_v58, 0.0  ;;  %v1085_v60 = vmul.f32 0.01, %v1081_v58  ;;  %v1080_v61 = vmul.f32 %v2232_v59, %v993_v51  ;;  %1875 = vmatprep.subr.bf16.mxu0 %v2223_v50 }
 0x97b   : > { %v2651_v62 = vsel %vm1083_vm5, %v1081_v58, %v1085_v60  ;;  %vm1082_vm6 = vcmp.gt.f32.partialorder %v1080_v61, 0.0  ;;  %v1084_v63 = vmul.f32 0.01, %v1080_v61 }
 0x97c   : > { %v2654_v0 = vrot.slane %v2651_v62, 1  ;;  %v2657_v1 = vrot.slane %v2651_v62, 2  ;;  %v2666_v5 = vrot.slane %v2651_v62, 3  ;;  %v1130_v7 = vrot.slane %v2651_v62, 4  ;;  %1876 = vmatpush3.bf16.msra.mxu0 %v2224_v52 }
 0x97d   : > { %v2659_v2 = vsel %vm1082_vm6, %v1080_v61, %v1084_v63  ;;  %v1134_v9 = vrot.slane %v2651_v62, 5  ;;  %v1138_v10 = vrot.slane %v2651_v62, 6  ;;  %v1142_v13 = vrot.slane %v2651_v62, 7 }
 0x97e   : > { %v2061_v3 = vpack.i.bf16 %v2654_v0, %v2657_v1  ;;  %v2056_v4 = vpack.i.bf16 %v2659_v2, %v2651_v62  ;;  %v2071_v6 = vpack.i.bf16 %v2657_v1, %v2666_v5  ;;  %v2081_v8 = vpack.i.bf16 %v2666_v5, %v1130_v7 }
 0x97f   : > { %v2086_v11 = vpack.i.bf16 %v1130_v7, %v1134_v9  ;;  %v2091_v12 = vpack.i.bf16 %v1134_v9, %v1138_v10  ;;  %v2682_v14 = vrot.slane %v2659_v2, 1  ;;  %v2096_v15 = vpack.i.bf16 %v1138_v10, %v1142_v13 }
 0x980   : > { %2062 = vrot.lane.b32.xlu1 %v2061_v3, %s2963_s26  ;;  %2057 = vrot.lane.b32.xlu0 %v2056_v4, %s2961_s27  ;;  %v2691_v17 = vrot.slane %v2659_v2, 2  ;;  %v2704_v22 = vrot.slane %v2659_v2, 3  ;;  %v1101_v27 = vrot.slane %v2659_v2, 4  ;;  %v1105_v28 = vrot.slane %v2659_v2, 5 }
 0x981   : > { %v2101_v16 = vpack.i.bf16 %v2682_v14, %v2654_v0  ;;  %v1109_v44 = vrot.slane %v2659_v2, 6  ;;  %v1113_v30 = vrot.slane %v2659_v2, 7 }
 0x982   : > { %v2106_v20 = vpack.i.bf16 %v2682_v14, %v2691_v17  ;;  %v2116_v25 = vpack.i.bf16 %v2691_v17, %v2704_v22  ;;  %v2126_v26 = vpack.i.bf16 %v2691_v17, %v2657_v1  ;;  %v2121_v38 = vpack.i.bf16 %v2704_v22, %v2666_v5 }
 0x983   : > { %v2141_v39 = vpack.i.bf16 %v1101_v27, %v1105_v28  ;;  %v2131_v42 = vpack.i.bf16 %v2704_v22, %v1101_v27  ;;  %v2146_v43 = vpack.i.bf16 %v1105_v28, %v1134_v9  ;;  %v2136_v45 = vpack.i.bf16 %v1101_v27, %v1130_v7 }
 0x984   : > { %2072 = vrot.lane.b32.xlu1 %v2071_v6, %s2964_s28  ;;  %2067 = vrot.lane.b32.xlu0 %v2056_v4, %s2962_s29  ;;  %v2156_v46 = vpack.i.bf16 %v1105_v28, %v1109_v44  ;;  %v2161_v49 = vpack.i.bf16 %v1109_v44, %v1138_v10  ;;  %v2171_v33 = vpack.i.bf16 %v1109_v44, %v1113_v30 }
 0x985   : > { %v2176_v51 = vpack.i.bf16 %v1113_v30, %v1142_v13 }
 0x988   : > { %2082 = vrot.lane.b32.xlu1 %v2081_v8, %s2955_s30  ;;  %2077 = vrot.lane.b32.xlu0 %v2056_v4, %s2957_s12  ;;  %s2974_s30 = smov 80  }
 0x98c   : > { %2087 = vrot.lane.b32.xlu1 %v2086_v11, %s2959_s11  ;;  %2092 = vrot.lane.b32.xlu0 %v2091_v12, %s2957_s12  ;;  %s2973_s12 = smov 48  }
 0x990   : > { %2097 = vrot.lane.b32.xlu0 %v2096_v15, %s2962_s29  ;;  %2102 = vrot.lane.b32.xlu1 %v2101_v16, %s2961_s27 }
 0x994   : > { %2107 = vrot.lane.b32.xlu0 %v2106_v20, %s2963_s26  ;;  %2112 = vrot.lane.b32.xlu1 %v2101_v16, %s2962_s29  ;;  %s1767_s29 = sshll.u32 %s2467_s18, 2  ;;  %s391_s18 = sand.u32 1, %s2319_s14  }
 0x998   : > { %2117 = vrot.lane.b32.xlu0 %v2116_v25, %s2964_s28  ;;  %2127 = vrot.lane.b32.xlu1 %v2126_v26, %s2961_s27  ;;  %s2975_s27 = smov 16  }
 0x99c   : > { %2122 = vrot.lane.b32.xlu0 %v2121_v38, %s2963_s26  ;;  %2142 = vrot.lane.b32.xlu1 %v2141_v39, %s2972_s20 }
 0x9a0   : > { %2132 = vrot.lane.b32.xlu0 %v2131_v42, %s2973_s12  ;;  %2147 = vrot.lane.b32.xlu1 %v2146_v43, %s2973_s12 }
 0x9a4   : > { %2137 = vrot.lane.b32.xlu0 %v2136_v45, %s2964_s28  ;;  %2157 = vrot.lane.b32.xlu1 %v2156_v46, %s2974_s30  ;;  %s1763_s28 = sshll.u32 %s391_s18, 2 }
 0x9a8   : > { %2152 = vrot.lane.b32.xlu0 %v2136_v45, %s2975_s27  ;;  %2162 = vrot.lane.b32.xlu1 %v2161_v49, %s2972_s20  ;;  %s406_s27 = scalar_lea.vmem %s2951_s7, %s1767_s29 }
 0x9ac   : > { %2167 = vrot.lane.b32.xlu0 %v2146_v43, %s2976_s0  ;;  %2172 = vrot.lane.b32.xlu1 %v2171_v33, %s2977_s25  ;;  %s1649_s0 = scalar_lea.sflag [#allocation4], %s391_s18 }
 0x9b0   : > { %2177 = vrot.lane.b32.xlu0 %v2176_v51, %s2974_s30  ;;  %2182 = vrot.lane.b32.xlu1 %v2161_v49, %s2973_s12  ;;  %s393_s12 = scalar_lea.vmem [#allocation5], %s1763_s28 }
 0x9b1   : > { %s1662_s30 = sshll.u32 %s393_s12, 4  ;;  %s1663_s30 = int_to_ptr.vmem [resolvable:$true] %s1662_s30 }
 0x9b2   : > { %s2263_s25 = scalar_lea.vmem %s1663_s30, 64 }
 0x9b3   : > { %p2264_p6 = scmp.ne.s32.totalorder %s1663_s30, %s2263_s25 }
 0x9b4   : > { %2187 = vrot.lane.b32.xlu0 %v2176_v51, %s2978_s1  ;;  %2192 = vrot.lane.b32.xlu1 %v2176_v51, %s2972_s20  ;;  %s1809_s20 = sshll.u32 %s2419_s17, 6 }
 0x9b5   : > { %s1660_s29 = scalar_lea.hbm %s2954_s10, %s1809_s20  ;;  %p2265_p9 = pnand %p2264_p6, %p2436_p5 }
 0x9b7   : > { %p2266_p10 = pneg %p2265_p9 }
 0x9f2   : > { %v2063_v36 = vpop.permute.xlu1 %2062  ;;  %v2058_v53 = vpop.permute.xlu0 %2057 }
 0x9f3   : > { %v2059_v4 = vunpack.i.l.bf16 %v2058_v53  ;;  %v2064_v6 = vunpack.i.l.bf16 %v2063_v36  ;;  %v2065_v11 = vunpack.i.h.bf16 %v2063_v36  ;;  %v2060_v13 = vunpack.i.h.bf16 %v2058_v53 }
 0x9f5   : > { %v1217_v9 = vsel %vm1146_vm7, %v2059_v4, %v2654_v0  ;;  %v1159_v0 = vsel %vm1146_vm7, %v2651_v62, %v2065_v11  ;;  %v1210_v28 = vsel %vm1146_vm7, %v2060_v13, %v2682_v14 }
 0x9f6   : > { %v2073_v54 = vpop.permute.xlu1 %2072  ;;  %v2779_v55 = vpop.permute.xlu0 %2067  ;;  %v1218_v18 = vsel %vm1148_vm8, %v1217_v9, %v2064_v6 }
 0x9f7   : > { %v2074_v10 = vunpack.i.l.bf16 %v2073_v54  ;;  %v2075_v15 = vunpack.i.h.bf16 %v2073_v54  ;;  %v2070_v39 = vunpack.i.h.bf16 %v2779_v55  ;;  %v2069_v44 = vunpack.i.l.bf16 %v2779_v55 }
 0x9f9   : > { %v1219_v24 = vsel %vm1150_vm9, %v1218_v18, %v2074_v10  ;;  %v1160_v29 = vsel %vm1148_vm8, %v1159_v0, %v2075_v15 }
 0x9fa   : > { %v2083_v56 = vpop.permute.xlu1 %2082  ;;  %v2781_v57 = vpop.permute.xlu0 %2077 }
 0x9fb   : > { %v2084_v12 = vunpack.i.l.bf16 %v2083_v56  ;;  %v2085_v19 = vunpack.i.h.bf16 %v2083_v56  ;;  %v2080_v47 = vunpack.i.h.bf16 %v2781_v57  ;;  %v2079_v31 = vunpack.i.l.bf16 %v2781_v57 }
 0x9fd   : > { %v1220_v26 = vsel %vm466_vm0, %v1219_v24, %v2084_v12  ;;  %v1161_v40 = vsel %vm1150_vm9, %v1160_v29, %v2085_v19 }
 0x9fe   : > { %v2088_v58 = vpop.permute.xlu1 %2087  ;;  %v2093_v59 = vpop.permute.xlu0 %2092 }
 0x9ff   : > { %v2089_v16 = vunpack.i.l.bf16 %v2088_v58  ;;  %v2090_v25 = vunpack.i.h.bf16 %v2088_v58  ;;  %v2094_v27 = vunpack.i.l.bf16 %v2093_v59  ;;  %v2095_v41 = vunpack.i.h.bf16 %v2093_v59 }
 0xa01   : > { %v1221_v37 = vsel %vm1153_vm10, %v1220_v26, %v2089_v16  ;;  %v1162_v45 = vsel %vm466_vm0, %v1161_v40, %v2090_v25 }
 0xa02   : > { %v2098_v60 = vpop.permute.xlu0 %2097  ;;  %v2103_v61 = vpop.permute.xlu1 %2102  ;;  %v1222_v48 = vsel %vm1155_vm11, %v1221_v37, %v2094_v27  ;;  %v1163_v35 = vsel %vm1153_vm10, %v1162_v45, %v2095_v41 }
 0xa03   : > { %v2099_v38 = vunpack.i.l.bf16 %v2098_v60  ;;  %v2105_v42 = vunpack.i.h.bf16 %v2103_v61  ;;  %v2100_v46 = vunpack.i.h.bf16 %v2098_v60  ;;  %v2104_v14 = vunpack.i.l.bf16 %v2103_v61 }
 0xa05   : > { %v2816_v32 = vsel %vm1157_vm12, %v1222_v48, %v2099_v38  ;;  %v1268_v50 = vsel %vm1146_vm7, %v2070_v39, %v2105_v42  ;;  %v2823_v54 = vsel %vm1155_vm11, %v1163_v35, %v2100_v46  ;;  %v1275_v55 = vsel %vm1146_vm7, %v2069_v44, %v2104_v14 }
 0xa06   : > { %v2783_v63 = vpop.permute.xlu0 %2107  ;;  %v2785_v3 = vpop.permute.xlu1 %2112  ;;  %v1343_v58 = vrot.slane %v2816_v32, 7  ;;  %v1269_v4 = vsel %vm1148_vm8, %v1268_v50, %v2691_v17  ;;  %v1276_v16 = vsel %vm1148_vm8, %v1275_v55, %v2657_v1  ;;  %v1787_v32 = vld [vmem:[%s2950_s6] ss:$0 sm:$0xff] }
 0xa07   : > { %v2115_v49 = vunpack.i.h.bf16 %v2785_v3  ;;  %v2114_v30 = vunpack.i.l.bf16 %v2785_v3  ;;  %v2110_v51 = vunpack.i.h.bf16 %v2783_v63  ;;  %v2109_v52 = vunpack.i.l.bf16 %v2783_v63 }
 0xa09   : > { %v1326_v59 = vsel %vm1146_vm7, %v2080_v47, %v2115_v49  ;;  %v1333_v60 = vsel %vm1146_vm7, %v2079_v31, %v2114_v30 }
 0xa0a   : > { %v2787_v7 = vpop.permute.xlu0 %2117  ;;  %v2128_v8 = vpop.permute.xlu1 %2127 }
 0xa0b   : > { %v2130_v33 = vunpack.i.h.bf16 %v2128_v8  ;;  %v2129_v34 = vunpack.i.l.bf16 %v2128_v8  ;;  %v2120_v56 = vunpack.i.h.bf16 %v2787_v7  ;;  %v2119_v57 = vunpack.i.l.bf16 %v2787_v7 }
 0xa0c   : > { %v1147_v8 = vsel %vm1146_vm7, %v2659_v2, %v2110_v51  ;;  %v1211_v7 = vsel %vm1148_vm8, %v1210_v28, %v2109_v52 }
 0xa0d   : > { %v1327_v63 = vsel %vm1148_vm8, %v1326_v59, %v2130_v33  ;;  %v1334_v3 = vsel %vm1148_vm8, %v1333_v60, %v2129_v34  ;;  %v1149_v13 = vsel %vm1148_vm8, %v1147_v8, %v2120_v56  ;;  %v1212_v15 = vsel %vm1150_vm9, %v1211_v7, %v2119_v57 }
 0xa0e   : > { %v2792_v20 = vpop.permute.xlu0 %2122  ;;  %v2794_v23 = vpop.permute.xlu1 %2142  ;;  %v1328_v2 = vsel %vm1150_vm9, %v1327_v63, %v2704_v22  ;;  %v1335_v24 = vsel %vm1150_vm9, %v1334_v3, %v2666_v5 }
 0xa0f   : > { %v2125_v9 = vunpack.i.h.bf16 %v2792_v20  ;;  %v2124_v10 = vunpack.i.l.bf16 %v2792_v20  ;;  %v2145_v20 = vunpack.i.h.bf16 %v2794_v23  ;;  %v2144_v28 = vunpack.i.l.bf16 %v2794_v23 }
 0xa11   : > { %v1270_v27 = vsel %vm1150_vm9, %v1269_v4, %v2125_v9  ;;  %v1277_v1 = vsel %vm1150_vm9, %v1276_v16, %v2124_v10 }
 0xa12   : > { %v2133_v43 = vpop.permute.xlu0 %2132  ;;  %v2806_v62 = vpop.permute.xlu1 %2147 }
 0xa13   : > { %v2135_v61 = vunpack.i.h.bf16 %v2133_v43  ;;  %v2134_v6 = vunpack.i.l.bf16 %v2133_v43  ;;  %v2150_v29 = vunpack.i.h.bf16 %v2806_v62  ;;  %v2149_v22 = vunpack.i.l.bf16 %v2806_v62 }
 0xa15   : > { %v1151_v18 = vsel %vm1150_vm9, %v1149_v13, %v2135_v61  ;;  %v1213_v25 = vsel %vm466_vm0, %v1212_v15, %v2134_v6 }
 0xa16   : > { %v2138_v36 = vpop.permute.xlu0 %2137  ;;  %v2158_v53 = vpop.permute.xlu1 %2157  ;;  %v1152_v39 = vsel %vm466_vm0, %v1151_v18, %v2145_v20  ;;  %v1214_v42 = vsel %vm1153_vm10, %v1213_v25, %v2144_v28 }
 0xa17   : > { %v2140_v17 = vunpack.i.h.bf16 %v2138_v36  ;;  %v2139_v19 = vunpack.i.l.bf16 %v2138_v36  ;;  %v2160_v0 = vunpack.i.h.bf16 %v2158_v53  ;;  %v2159_v26 = vunpack.i.l.bf16 %v2158_v53 }
 0xa19   : > { %v1271_v5 = vsel %vm466_vm0, %v1270_v27, %v2140_v17  ;;  %v1278_v41 = vsel %vm466_vm0, %v1277_v1, %v2139_v19  ;;  %v1154_v23 = vsel %vm1153_vm10, %v1152_v39, %v2160_v0  ;;  %v1215_v45 = vsel %vm1155_vm11, %v1214_v42, %v2159_v26 }
 0xa1a   : > { %v2153_v11 = vpop.permute.xlu0 %2152  ;;  %v2163_v12 = vpop.permute.xlu1 %2162  ;;  %v1272_v62 = vsel %vm1153_vm10, %v1271_v5, %v2150_v29  ;;  %v1279_v33 = vsel %vm1153_vm10, %v1278_v41, %v2149_v22 }
 0xa1b   : > { %v2165_v43 = vunpack.i.h.bf16 %v2163_v12  ;;  %v2164_v44 = vunpack.i.l.bf16 %v2163_v12  ;;  %v2155_v46 = vunpack.i.h.bf16 %v2153_v11  ;;  %v2154_v14 = vunpack.i.l.bf16 %v2153_v11 }
 0xa1d   : > { %v1273_v51 = vsel %vm1155_vm11, %v1272_v62, %v2165_v43  ;;  %v1280_v52 = vsel %vm1155_vm11, %v1279_v33, %v2164_v44  ;;  %v1329_v55 = vsel %vm466_vm0, %v1328_v2, %v2155_v46  ;;  %v1336_v56 = vsel %vm466_vm0, %v1335_v24, %v2154_v14 }
 0xa1e   : > { %v2168_v37 = vpop.permute.xlu0 %2167  ;;  %v2173_v38 = vpop.permute.xlu1 %2172  ;;  %vm1544_vm0 = vcmask 257024  }
 0xa1f   : > { %v2174_v40 = vunpack.i.l.bf16 %v2173_v38  ;;  %v2170_v47 = vunpack.i.h.bf16 %v2168_v37  ;;  %v2169_v48 = vunpack.i.l.bf16 %v2168_v37  ;;  %v2175_v49 = vunpack.i.h.bf16 %v2173_v38 }
 0xa21   : > { %v1216_v34 = vsel %vm1157_vm12, %v1215_v45, %v2174_v40  ;;  %v1330_v60 = vsel %vm1153_vm10, %v1329_v55, %v2170_v47  ;;  %v1337_v61 = vsel %vm1153_vm10, %v1336_v56, %v2169_v48  ;;  %v1156_v63 = vsel %vm1155_vm11, %v1154_v23, %v2175_v49  ;;  %v2225_v23 = vld [vmem:[%s2952_s8 + $0x8] sm:$0xff]   ;;  %v2226_v45 = vld [vmem:[%s2952_s8] sm:$0xff]  }
 0xa22   : > { %v2178_v30 = vpop.permute.xlu0 %2177  ;;  %v2183_v31 = vpop.permute.xlu1 %2182  ;;  %v1342_v3 = vrot.slane %v1216_v34, 7  ;;  %1987 = vmatpush3.bf16.msra.mxu1 %v2225_v23 }
 0xa23   : > { %v2180_v35 = vunpack.i.h.bf16 %v2178_v30  ;;  %v2179_v50 = vunpack.i.l.bf16 %v2178_v30  ;;  %v2185_v36 = vunpack.i.h.bf16 %v2183_v31  ;;  %v2184_v53 = vunpack.i.l.bf16 %v2183_v31  ;;  %1988 = vmatprep.subr.bf16.mxu1 %v2334_v21  ;;  %v1562_v30 = vld [vmem:[%s406_s27] sm:$0xf]  ;;  %s2342_s27 = smov [#allocation5]  }
 0xa24   : > { %v1804_v21 = vld [vmem:[%s2953_s9] ss:$0 sm:$0xff]  ;;  %s2267_s21 = sshll.u32 %s2342_s27, 4  ;;  %s2268_s21 = int_to_ptr.vmem [resolvable:$false] %s2267_s21 }
 0xa25   : > { %v1274_v57 = vsel %vm1157_vm12, %v1273_v51, %v2180_v35  ;;  %v1281_v59 = vsel %vm1157_vm12, %v1280_v52, %v2179_v50  ;;  %v1331_v13 = vsel %vm1155_vm11, %v1330_v60, %v2185_v36  ;;  %v1338_v15 = vsel %vm1155_vm11, %v1337_v61, %v2184_v53  ;;  %s2269_s17 = scalar_lea.vmem %s2268_s21, 128  ;;  %p2270_p11 = scmp.lt.s32.totalorder %s1663_s30, %s2268_s21 }
 0xa26   : > { %v2188_v4 = vpop.permute.xlu0 %2187  ;;  %v2193_v6 = vpop.permute.xlu1 %2192  ;;  %v1348_v11 = vrot.slane %v1274_v57, 6  ;;  %v1349_v12 = vrot.slane %v1281_v59, 6  ;;  %1989 = vmatpush3.bf16.msra.mxu1 %v2226_v45  ;;  %p2271_p12 = scmp.lt.s32.totalorder %s2269_s17, %s2263_s25 }
 0xa27   : > { %v2190_v8 = vunpack.i.h.bf16 %v2188_v4  ;;  %v2189_v7 = vunpack.i.l.bf16 %v2188_v4  ;;  %v2195_v9 = vunpack.i.h.bf16 %v2193_v6  ;;  %v2194_v10 = vunpack.i.l.bf16 %v2193_v6 }
 0xa28   : > { %p2272_p13 = por %p2271_p12, %p2270_p11 }
 0xa29   : > { %v1158_v16 = vsel %vm1157_vm12, %v1156_v63, %v2190_v8  ;;  %v1165_v17 = vsel %vm1157_vm12, %v2823_v54, %v2189_v7  ;;  %v1332_v18 = vsel %vm1157_vm12, %v1331_v13, %v2195_v9  ;;  %v1339_v19 = vsel %vm1157_vm12, %v1338_v15, %v2194_v10 }
 0xa2a   : > { %v1359_v2 = vsel %vm1358_vm13, %v1158_v16, %v1342_v3  ;;  %v1360_v24 = vsel %vm1358_vm13, %v1165_v17, %v1343_v58  ;;  %v1354_v20 = vrot.slane %v1332_v18, 5  ;;  %v1355_v25 = vrot.slane %v1339_v19, 5  ;;  %p2273_p0 = pnand %p2272_p13, %p2266_p10 }
 0xa2b   : > { %v1363_v0 = vsel %vm1361_vm14, %v1360_v24, %v1349_v12  ;;  %v1362_v26 = vsel %vm1361_vm14, %v1359_v2, %v1348_v11 }
 0xa2c   : > { %v1366_v27 = vsel %vm1364_vm15, %v1363_v0, %v1355_v25  ;;  %v1365_v54 = vsel %vm1364_vm15, %v1362_v26, %v1354_v20 }
 0xa2d   : > { %v1368_v1 = vpack.c.bf16 %v1366_v27, %v1366_v27  ;;  %v1367_v28 = vpack.c.bf16 %v1365_v54, %v1365_v54 }
 0xa2f   : > { %1536 = vmatprep.mubr.bf16.mxu0 %v1368_v1 }
 0xa30   : > { %1537 = vmatmul.mubr.bf16.vlgmr.msra.gmra.mxu0 %v1367_v28 }
 0xaf0   : > { %v1877_v29 = vpop.f32.mrf.mxu0 }
 0xaf2   : > { %v1878_v37 = vpop.f32.mrf.mxu0 }
 0xaf3   : > { %v1879_v58 = vadd.f32 %v1878_v37, %v1877_v29 }
 0xaf4   : > { %v1880_v38 = vpop.f32.mrf.mxu0 }
 0xaf5   : > { %v1539_v22 = vadd.f32 %v1879_v58, %v1787_v32 }
 0xaf6   : > { %v1881_v5 = vpop.f32.mrf.mxu0 }
 0xaf7   : > { %v1545_v39 = vsel %vm1544_vm0, %v1539_v22, 0.0 }
 0xaf8   : > { %1546 = vadd.xlane.f32.xlu0 %v1545_v39 }
 0xb81   : > { %v1547_v40 = vpop.xlane.xlu0 %1546 }
 0xb82   : > { %v1549_v41 = vmul.f32 0.03125, %v1547_v40 }
 0xb84   : > { %v1550_v42 = vsub.f32 %v1539_v22, %v1549_v41 }
 0xb86   : > { %v1551_v43 = vmul.f32 %v1550_v42, %v1550_v42 }
 0xb88   : > { %v1552_v44 = vsel %vm1544_vm0, %v1551_v43, 0.0 }
 0xb89   : > { %1553 = vadd.xlane.f32.xlu1 %v1552_v44 }
 0xc12   : > { %v1554_v46 = vpop.xlane.xlu1 %1553 }
 0xc13   : > { %v1555_v14 = vmul.f32 0.03125, %v1554_v46 }
 0xc15   : > { %v1556_v62 = vadd.f32 1e-05, %v1555_v14 }
 0xc17   : > { %2233 = vrsqrt.f32 %v1556_v62 }
 0xc24   : > { %v2234_v47 = vpop.eup %2233 }
 0xc25   : > { %v1558_v48 = vmul.f32 %v2234_v47, %v1550_v42 }
 0xc27   : > { %vm1559_vm1 = vcmp.gt.f32.partialorder %v1558_v48, 0.0  ;;  %v1560_v49 = vmul.f32 0.01, %v1558_v48 }
 0xc29   : > { %v1561_v31 = vsel %vm1559_vm1, %v1558_v48, %v1560_v49 }
 0xc2a   : > { %v1563_v33 = vmul.f32 %v1562_v30, %v1561_v31 }
 0xc2c   : > { %v1564_v34 = vmul.f32 1.5384616, %v1563_v33 }
 0xc2e   : > { %v1565_v35 = vpack.c.bf16 %v1564_v34, %v1564_v34 }
 0xc30   : > { %1991 = vmatmul.mubr.msk.bf16.vlgmr.msra.gmra.mxu1 %vm1148_vm8, %v1565_v35 }
 0xcf0   : > { %v1626_v50 = vpop.f32.mrf.mxu1 }
 0xcf1   : > { %v1627_v51 = vadd.f32 %v1804_v21, %v1626_v50 }
 0xcf2   : > { %v1992_v52 = vpop.f32.mrf.mxu1 }
 0xcf3   : > { %v1633_v36 = vsel %vm1632_vm2, %v1627_v51, 0.0 }
 0xcf4   : > { %1634 = vadd.xlane.f32.xlu0 %v1633_v36  ;;  %v1629_v53 = vpop.f32.mrf.mxu1 }
 0xcf6   : > { %v1993_v55 = vpop.f32.mrf.mxu1 }
 0xd7d   : > { %v1635_v56 = vpop.xlane.xlu0 %1634 }
 0xd7e   : > { %v1637_v57 = vmul.f32 0.125, %v1635_v56 }
 0xd80   : > { %v1638_v59 = vsub.f32 %v1627_v51, %v1637_v57 }
 0xd82   : > { %v1639_v60 = vmul.f32 %v1638_v59, %v1638_v59 }
 0xd84   : > { %v1640_v61 = vsel %vm1632_vm2, %v1639_v60, 0.0 }
 0xd85   : > { %1641 = vadd.xlane.f32.xlu0 %v1640_v61 }
 0xe0e   : > { %v1642_v63 = vpop.xlane.xlu0 %1641 }
 0xe0f   : > { %v1643_v3 = vmul.f32 0.125, %v1642_v63 }
 0xe11   : > { %v1644_v4 = vadd.f32 1e-05, %v1643_v3 }
 0xe13   : > { %2235 = vrsqrt.f32 %v1644_v4 }
 0xe20   : > { %v2236_v6 = vpop.eup %2235 }
 0xe21   : > { %v1646_v8 = vmul.f32 %v2236_v6, %v1638_v59 }
 0xe23   : > { %1647 = vst.msk [vmem:[%s393_s12] sm:$0xf] %vm1632_vm2, %v1646_v8 }
 0xe24   : > { %2276 = shalt.err (!%p2273_p0)
}
 0xe25   : > { %s2277_s1 = scalar_lea.hbm %s1660_s29, 64  ;;  %s2281_s20 = scalar_lea.hbm %s2954_s10, 128 }
 0xe26   : > { %p2278_p1 = scmp.ne.s32.totalorder %s1660_s29, %s2277_s1  ;;  %p2282_p4 = scmp.lt.s32.totalorder %s1660_s29, %s2954_s10 }
 0xe27   : > { %p2283_p7 = scmp.lt.s32.totalorder %s2281_s20, %s2277_s1 }
 0xe28   : > { %p2279_p2 = pnand %p2278_p1, %p2436_p5 }
 0xe29   : > { %p2284_p8 = por %p2283_p7, %p2282_p4 }
 0xe2a   : > { %p2280_p3 = pneg %p2279_p2 }
 0xe2c   : > { %p2285_p6 = pnand %p2284_p8, %p2280_p3 }
 0xe2e   : > { %2288 = shalt.err (!%p2285_p6)
}
 0xe2f   : > { %1998 = dma.vmem_to_hbm [thread:$0]  (%p2436_p5), %s1663_s30, 64, %s1660_s29, %s1649_s0  }
 0xe30 PF: > { %p2010_p9 = scmp.ge.s32.totalorder %s2327_s16, 2  ;;  %s1674_s26 = sand.u32 1, %s2315_s13  }
 0xe31   : > { %p2979_p10 = scmp.ne.s32.totalorder %s2968_s24, 0  ;;  %s1675_s25 = scalar_lea.sflag [#allocation4], %s1674_s26 }
 0xe33   : > { %p2005_p11 = pnand %p2010_p9, %p2979_p10 }
 0xe35   : > { %p2006_p12 = pneg %p2005_p11 }
 0xe37   : > { %2310 = dma.done.wait (%p2006_p12), %s1675_s25, 64  }
 0xe38   : > { %2312 = vsyncadd (%p2006_p12), %s1675_s25, 4294967232  ;;  %p21_p13 = scmp.ge.s32.totalorder %s2423_s19, 4   ;;  %s2980_s13 = smov %s2319_s14 }
 0xe39   : > { %s2981_s14 = smov %s2323_s15  ;;  %s2982_s15 = smov %s2434_s22 }
 0xe3a   : > { %s2983_s16 = smov %s2423_s19  ;;  %23 = sbr.rel (!%p21_p13) target bundleno = 7 (0x7), region = 106 }
 0xe3f   :  { %1680 = vsyncpa [#allocation3], 1 }
 0xe40   :  { %1682 = vsyncpa [#allocation3 + $0x1], 1 }
 0xe41   :  { %1683 = vsyncpa [#allocation4], 1 }
 0xe42   :  { %1685 = vsyncpa [#allocation4 + $0x1], 1 }

</bundles_post_ra>
